<compile_context>
chip_gen: v7x
topology: tpu7x:2x2x1
jax: 0.10.0
libtpu: 0.0.40
codegen_flags: <defaults>
</compile_context>

<pallas_src>
import functools

import jax
import jax.numpy as jnp
from jax import lax
from jax.experimental import pallas as pl
from jax.experimental.pallas import tpu as pltpu

CHANNELS = 3
D_FEATURES = 32
BN_EPS = 1e-5
LANE = 128


def _round_up(x, m):
    return ((x + m - 1) // m) * m


# ----------------------------------------------------------------------------
# Pallas kernel: fused (im2col-matmul conv, BN scale pre-folded) + shift + act
# ----------------------------------------------------------------------------
def _fused_conv_kernel(p_ref, w_ref, shift_ref, o_ref, *, act):
    # p_ref:     (tm, K) bf16 im2col patch rows
    # w_ref:     (K,  N) bf16 flattened conv weight (BN scale folded in)
    # shift_ref: (1,  N) f32  BN shift (beta - mean*scale), 0 if no BN
    acc = jnp.dot(p_ref[...], w_ref[...], preferred_element_type=jnp.float32)
    y = acc + shift_ref[...]
    if act == "leaky_relu":
        y = jnp.where(y > 0, y, 0.2 * y)
    elif act == "sigmoid":
        y = jax.nn.sigmoid(y)
    o_ref[...] = y.astype(o_ref.dtype)


def fused_conv_matmul(patches, w_mat, shift, act, out_dtype):
    """patches: [M, K] bf16, w_mat: [K, N] bf16, shift: [1, N] f32 -> [M, N]."""
    patches = patches.astype(jnp.bfloat16)
    w_mat = w_mat.astype(jnp.bfloat16)
    M, K = patches.shape
    N = w_mat.shape[1]

    # 2 "parallel" grid steps when the layer has enough rows (keeps both
    # TensorCores busy on v7x); otherwise a single step (v5e/v6e are single-TC,
    # so extra grid steps are pure per-step overhead).
    if M >= 512 and (M // 2) % 8 == 0:
        tm = M // 2
    else:
        tm = M
    grid = (M // tm,)

    kernel = functools.partial(_fused_conv_kernel, act=act)
    return pl.pallas_call(
        kernel,
        out_shape=jax.ShapeDtypeStruct((M, N), out_dtype),
        grid_spec=pltpu.PrefetchScalarGridSpec(
            num_scalar_prefetch=0,
            grid=grid,
            in_specs=[
                pl.BlockSpec((tm, K), lambda i: (i, 0)),
                pl.BlockSpec((K, N), lambda i: (0, 0)),
                pl.BlockSpec((1, N), lambda i: (0, 0)),
            ],
            out_specs=pl.BlockSpec((tm, N), lambda i: (i, 0)),
        ),
        compiler_params=pltpu.CompilerParams(
            dimension_semantics=("parallel",),
        ),
    )(patches, w_mat, shift)


# ----------------------------------------------------------------------------
# Plain-JAX glue: NHWC im2col, weight flattening, BN folding, channel padding
# ----------------------------------------------------------------------------
def im2col_nhwc(x, k, stride, pad):
    """x: [N, H, W, C] -> patches [N*Ho*Wo, k*k*C] (tap order kh, kw, c)."""
    if pad:
        x = jnp.pad(x, ((0, 0), (pad, pad), (pad, pad), (0, 0)))
    n, hp, wp, c = x.shape
    ho = (hp - k) // stride + 1
    wo = (wp - k) // stride + 1
    taps = []
    for i in range(k):
        for j in range(k):
            taps.append(
                x[:, i: i + stride * ho: stride, j: j + stride * wo: stride, :]
            )
    p = jnp.stack(taps, axis=3)                     # [N, Ho, Wo, k*k, C]
    return p.reshape(n * ho * wo, k * k * c), ho, wo


def conv_bn_act(x_nhwc, w, bn, act, stride, pad, out_dtype):
    """x_nhwc: [N,H,W,Cin_pad] bf16 (channels >= real Cin are zero);
    w: [Cout, Cin, k, k] (PyTorch OIHW)."""
    n = x_nhwc.shape[0]
    cin_pad = x_nhwc.shape[-1]
    cout, cin, k, _ = w.shape
    cout_pad = max(_round_up(cout, LANE), LANE)     # lane-dense output stores

    if bn is None:
        scale = jnp.ones((cout,), jnp.float32)
        shift = jnp.zeros((cout,), jnp.float32)
    else:
        scale = bn["gamma"] / jnp.sqrt(bn["var"] + BN_EPS)
        shift = bn["beta"] - bn["mean"] * scale

    # OIHW -> (kh, kw, cin, cout); fold BN scale into output columns; zero-pad
    # cin -> cin_pad (matches zero-padded activation channels, contributes 0)
    # and cout -> cout_pad (lane-dense, padded channels produce exact zeros
    # after the shift=0 + LeakyReLU).
    w_t = jnp.transpose(w, (2, 3, 1, 0)) * scale
    w_t = jnp.pad(w_t, ((0, 0), (0, 0), (0, cin_pad - cin), (0, cout_pad - cout)))
    w_mat = w_t.reshape(k * k * cin_pad, cout_pad).astype(jnp.bfloat16)
    shift_p = jnp.pad(shift, (0, cout_pad - cout)).reshape(1, cout_pad)

    patches, ho, wo = im2col_nhwc(x_nhwc, k, stride, pad)   # [M, k*k*cin_pad]
    out = fused_conv_matmul(patches, w_mat, shift_p, act, out_dtype)
    return out.reshape(n, ho, wo, cout_pad)


# ----------------------------------------------------------------------------
# Parameter init (deterministic, DCGAN-style) and forward
# ----------------------------------------------------------------------------
def init_params(key):
    f = D_FEATURES
    conv_shapes = [
        (f, CHANNELS, 4, 4),
        (2 * f, f, 4, 4),
        (4 * f, 2 * f, 4, 4),
        (8 * f, 4 * f, 4, 4),
        (1, 8 * f, 4, 4),
    ]
    bn_sizes = [None, 2 * f, 4 * f, 8 * f, None]
    params = []
    for shape, bn_c in zip(conv_shapes, bn_sizes):
        key, kw, kg = jax.random.split(key, 3)
        w = 0.02 * jax.random.normal(kw, shape, jnp.float32)
        bn = None
        if bn_c is not None:
            bn = {
                "gamma": 1.0 + 0.02 * jax.random.normal(kg, (bn_c,), jnp.float32),
                "beta": jnp.zeros((bn_c,), jnp.float32),
                "mean": jnp.zeros((bn_c,), jnp.float32),
                "var": jnp.ones((bn_c,), jnp.float32),
            }
        params.append({"w": w, "bn": bn})
    return params


def discriminator_forward(x, params):
    # x: [N, CHANNELS, H, W] (PyTorch NCHW); internally NHWC bf16 activations.
    # Conv(s2,p1) -> [Dropout] -> LeakyReLU, x4, then Conv(4,s1,p0) -> Sigmoid
    x = jnp.transpose(x, (0, 2, 3, 1)).astype(jnp.bfloat16)       # NHWC
    # Pad input channels 3 -> 8 so layer-1 K = 4*4*8 = 128 (lane aligned).
    x = jnp.pad(x, ((0, 0), (0, 0), (0, 0), (0, 8 - CHANNELS)))

    x = conv_bn_act(x, params[0]["w"], params[0]["bn"], "leaky_relu", 2, 1,
                    out_dtype=jnp.bfloat16)
    x = conv_bn_act(x, params[1]["w"], params[1]["bn"], "leaky_relu", 2, 1,
                    out_dtype=jnp.bfloat16)
    x = conv_bn_act(x, params[2]["w"], params[2]["bn"], "leaky_relu", 2, 1,
                    out_dtype=jnp.bfloat16)
    x = conv_bn_act(x, params[3]["w"], params[3]["bn"], "leaky_relu", 2, 1,
                    out_dtype=jnp.bfloat16)
    x = conv_bn_act(x, params[4]["w"], params[4]["bn"], "sigmoid", 1, 0,
                    out_dtype=jnp.float32)
    # x: [N, 1, 1, 128] -- real output is channel 0 ([N,1,1,1] NHWC == NCHW).
    return x[:, :, :, :1]


# ----------------------------------------------------------------------------
# Pure-JAX f32 reference (XLA conv) for correctness check
# ----------------------------------------------------------------------------
def _ref_conv(x, w, stride, pad):
    return lax.conv_general_dilated(
        x, w, (stride, stride), [(pad, pad), (pad, pad)],
        dimension_numbers=("NCHW", "OIHW", "NCHW"),
    )


def reference_forward(x, params):
    def block(x, p, stride, pad, act):
        y = _ref_conv(x, p["w"], stride, pad)
        if p["bn"] is not None:
            bn = p["bn"]
            s = (bn["gamma"] / jnp.sqrt(bn["var"] + BN_EPS)).reshape(1, -1, 1, 1)
            b = (bn["beta"] - bn["mean"] * bn["gamma"]
                 / jnp.sqrt(bn["var"] + BN_EPS)).reshape(1, -1, 1, 1)
            y = y * s + b
        if act == "leaky_relu":
            y = jnp.where(y > 0, y, 0.2 * y)
        else:
            y = jax.nn.sigmoid(y)
        return y

    x = block(x, params[0], 2, 1, "leaky_relu")
    x = block(x, params[1], 2, 1, "leaky_relu")
    x = block(x, params[2], 2, 1, "leaky_relu")
    x = block(x, params[3], 2, 1, "leaky_relu")
    x = block(x, params[4], 1, 0, "sigmoid")
    return x


if __name__ == "__main__":
    key = jax.random.PRNGKey(0)
    kx, kp = jax.random.split(key)

    # DCGAN discriminator geometry requires 64x64 inputs (64->32->16->8->4->1).
    x = jax.random.normal(kx, (2, CHANNELS, 64, 64), jnp.float32)
    params = init_params(kp)

    out = jax.block_until_ready(discriminator_forward(x, params))
    assert out.shape == (2, 1, 1, 1), out.shape

    ref = jax.block_until_ready(reference_forward(x, params))
    # bf16 MXU operands vs f32 reference -> relaxed tolerance.
    err = float(jnp.max(jnp.abs(out - ref)))
    assert err < 5e-3, err

    print("KERNEL_OK")
</pallas_src>

<mosaic_0001>
module attributes {stable_mosaic.version = 11 : i64} {
  func.func @_fused_conv_kernel(%arg0: i32, %arg1: memref<1024x128xbf16, #tpu.memory_space<vmem>>, %arg2: memref<128x128xbf16, #tpu.memory_space<vmem>>, %arg3: memref<1x128xf32, #tpu.memory_space<vmem>>, %arg4: memref<1024x128xbf16, #tpu.memory_space<vmem>>) attributes {dimension_semantics = [#tpu.dimension_semantics<parallel>], iteration_bounds = array<i64: 2>, scalar_prefetch = 0 : i64, scratch_operands = 0 : i64, tpu.core_type = #tpu.core_type<tc>, window_params = [{transform_indices = @transform_0, window_bounds = array<i64: 1024, 128>}, {pipeline_mode = #tpu.pipeline_mode<synchronous>, transform_indices = @transform_1, window_bounds = array<i64: 128, 128>}, {pipeline_mode = #tpu.pipeline_mode<synchronous>, transform_indices = @transform_2, window_bounds = array<i64: 1, 128>}, {transform_indices = @transform_3, window_bounds = array<i64: 1024, 128>}]} {
    %c0 = arith.constant 0 : index
    %c0_0 = arith.constant 0 : index
    %0 = vector.load %arg1[%c0, %c0_0] : memref<1024x128xbf16, #tpu.memory_space<vmem>>, vector<1024x128xbf16>
    %c0_1 = arith.constant 0 : index
    %c0_2 = arith.constant 0 : index
    %1 = vector.load %arg2[%c0_1, %c0_2] : memref<128x128xbf16, #tpu.memory_space<vmem>>, vector<128x128xbf16>
    %cst = arith.constant dense<0.000000e+00> : vector<1024x128xf32>
    %2 = tpu.matmul %0, %1, %cst {dimension_numbers = #tpu.dot_dimension_numbers<[1], [0], [0], [1], [0, 0, 1, 1], [], []>} : vector<1024x128xbf16>, vector<128x128xbf16>, vector<1024x128xf32> -> vector<1024x128xf32>
    %c0_3 = arith.constant 0 : index
    %c0_4 = arith.constant 0 : index
    %3 = vector.load %arg3[%c0_3, %c0_4] : memref<1x128xf32, #tpu.memory_space<vmem>>, vector<1x128xf32>
    %4 = vector.broadcast %3 : vector<1x128xf32> to vector<1024x128xf32>
    %5 = arith.addf %2, %4 : vector<1024x128xf32>
    %cst_5 = arith.constant 0.000000e+00 : f32
    %6 = vector.broadcast %cst_5 : f32 to vector<1024x128xf32>
    %7 = arith.cmpf ogt, %5, %6 : vector<1024x128xf32>
    %cst_6 = arith.constant 2.000000e-01 : f32
    %8 = vector.broadcast %cst_6 : f32 to vector<1024x128xf32>
    %9 = arith.mulf %8, %5 : vector<1024x128xf32>
    %10 = arith.select %7, %5, %9 : vector<1024x128xi1>, vector<1024x128xf32>
    %11 = arith.truncf %10 : vector<1024x128xf32> to vector<1024x128xbf16>
    %c0_7 = arith.constant 0 : index
    %c0_8 = arith.constant 0 : index
    %12 = vector.load %arg4[%c0_7, %c0_8] : memref<1024x128xbf16, #tpu.memory_space<vmem>>, vector<1024x128xbf16>
    tpu.vector_store %arg4[%c0_7, %c0_8], %11 {strides = array<i32>} : memref<1024x128xbf16, #tpu.memory_space<vmem>>, vector<1024x128xbf16>,
    return
  }
  func.func @transform_0(%arg0: i32) -> (i32, i32) {
    %c0_i32 = arith.constant 0 : i32
    %c0_i32_0 = arith.constant 0 : i32
    return %arg0, %c0_i32 : i32, i32
  }
  func.func @transform_1(%arg0: i32) -> (i32, i32) {
    %c0_i32 = arith.constant 0 : i32
    %c0_i32_0 = arith.constant 0 : i32
    %c0_i32_1 = arith.constant 0 : i32
    return %c0_i32, %c0_i32_0 : i32, i32
  }
  func.func @transform_2(%arg0: i32) -> (i32, i32) {
    %c0_i32 = arith.constant 0 : i32
    %c0_i32_0 = arith.constant 0 : i32
    %c0_i32_1 = arith.constant 0 : i32
    return %c0_i32, %c0_i32_0 : i32, i32
  }
  func.func @transform_3(%arg0: i32) -> (i32, i32) {
    %c0_i32 = arith.constant 0 : i32
    %c0_i32_0 = arith.constant 0 : i32
    return %arg0, %c0_i32 : i32, i32
  }
}

</mosaic_0001>

<bundles_post_ra>
// kernel: tpu_custom_call.1
= control target key start
LH: loop header
LB: loop body
LE: loop exit
PB: predicated region body
PF: predicated region fallthrough
CT: control target
= control target key end

     0   :  { %8 = vsyncpa [#allocation3], 0  ;;  %s4327_s0 = inlined_call_operand.hbm [shape: bf16[2048,128], index: 0, kind: input, shape index: {}]   ;;  %s4328_s1 = inlined_call_operand.hbm [shape: bf16[128,128], index: 1, kind: input, shape index: {}]   ;;  %s4329_s2 = inlined_call_operand.vmem [shape: f32[1,128], index: 2, kind: input, shape index: {}]   ;;  %s4330_s3 = inlined_call_operand.hbm [shape: bf16[2048,128], index: 3, kind: output, shape index: {}]  }
   0x1   :  { %10 = vsyncpa [#allocation3 + $0x1], 0 }
   0x2   :  { %11 = vsyncpa [#allocation6], 0 }
   0x3   :  { %12 = vsyncpa [#allocation4], 0 }
   0x4   :  { %14 = vsyncpa [#allocation4 + $0x1], 0  ;;  %s3709_s12 = smov 0   ;;  %s3711_s13 = smov 0  }
   0x5   :  { %s3713_s14 = smov 0   ;;  %s3715_s15 = smov 0  }
   0x6 LB: > { %s3730_s16 = sadd.s32 4294967295, %s3680_s15   ;;  %s2456_s17 = sadd.s32 4294967294, %s3680_s15   ;;  %s3680_s15 = sphi %s3715_s15, %s4350_s15   ;;  %s3676_s14 = sphi %s3713_s14, %s4349_s14   ;;  %s3672_s13 = sphi %s3711_s13, %s4348_s13   ;;  %s3668_s12 = sphi %s3709_s12, %s4347_s12  }
   0x7   : > { %p40_p0 = scmp.ne.s32.totalorder %s3672_s13, %s3668_s12  ;;  %p4331_p1 = scmp.eq.s32.totalorder %s3730_s16, 0 }
   0x8   : > { %p112_p3 = scmp.eq.s32.totalorder %s2456_s17, 1  ;;  %p2457_p5 = scmp.ge.s32.totalorder %s3680_s15, 1 }
   0x9   : > { %p3739_p4 = por %p4331_p1, %p40_p0  ;;  %p119_p7 = scmp.lt.s32.totalorder %s3680_s15, 3 }
   0xa   : > { %p3744_p6 = por %p112_p3, %p40_p0  ;;  %s3682_s21 = smov [#allocation5]  }
   0xb   : > { %s4334_s18 = scalar_select %p3739_p4, 1, 0 }
   0xc   : > { %s4335_s19 = scalar_select %p3744_p6, 1, 0 }
   0xd   : > { %p3749_p8 = pnand %p2457_p5, %p119_p7  ;;  %s131_s22 = sshll.u32 %s3682_s21, 4  ;;  %s3753_s22 = int_to_ptr.vmem [resolvable:$true] %s131_s22 }
   0xe   : > { %s3765_s24 = sadd.s32 1, %s3680_s15   ;;  %s27_s25 = sadd.s32 1, %s3676_s14 }
   0xf   : > { %s4336_s20 = scalar_select %p3749_p8, 1, 0 }
  0x10   : > { %p3426_p9 = pneg %p3749_p8  ;;  %s24_s26 = ssub.s32 %s3680_s15, %s3765_s24 }
  0x11   : > { %s3552_s29 = scalar_lea.hbm %s4328_s1, 1024 }
  0x12   : > { %p3760_p11 = pnand %p3426_p9, %p4331_p1  ;;  %p3553_p12 = scmp.ne.s32.totalorder %s4328_s1, %s3552_s29 }
  0x13   : > { %p3559_p5 = scmp.lt.u32.totalorder %s3552_s29, %s4328_s1 }
  0x14   : > { %p3554_p13 = pneg %p3760_p11 }
  0x16   : > { %p3555_p0 = pnand %p3554_p13, %p3553_p12 }
  0x18   : > { %p3556_p3 = pneg %p3555_p0 }
  0x1a   : > { %p3561_p7 = pnand %p3559_p5, %p3556_p3 }
  0x1c   : > { %3564 = shalt.err (!%p3561_p7)
}
  0x1d   : > { %s3565_s7 = scalar_lea.vmem %s3753_s22, 1024  ;;  %p3573_p2 = scmp.lt.s32.totalorder %s3753_s22, %s3753_s22 }
  0x1e   : > { %p3566_p9 = scmp.ne.s32.totalorder %s3753_s22, %s3565_s7  ;;  %p3574_p6 = scmp.lt.s32.totalorder %s3565_s7, %s3565_s7 }
  0x20   : > { %p3568_p10 = pnand %p3566_p9, %p3554_p13  ;;  %p3575_p4 = por %p3574_p6, %p3573_p2 }
  0x22   : > { %p3569_p1 = pneg %p3568_p10 }
  0x24   : > { %p3576_p8 = pnand %p3575_p4, %p3569_p1 }
  0x26   : > { %3579 = shalt.err (!%p3576_p8)
}
  0x27   : > { %s3683_s8 = smov 64   ;;  %s3684_s9 = smov 4  }
  0x28   : > { %3429 = dma.hbm_to_vmem [thread:$0]  (!%p3760_p11), %s4328_s1, 1024, %s3753_s22, [#allocation6], %s3683_s8, %s3683_s8, %s3684_s9  }
  0x29   : > { %p25_p1 = scmp.eq.s32.totalorder %s24_s26, 0  ;;  %p34_p2 = scmp.ne.s32.totalorder %s3676_s14, %s3672_s13 }
  0x2a   : > { %p35_p4 = scmp.eq.s32.totalorder %s3680_s15, 0  ;;  %p3439_p6 = scmp.lt.s32.totalorder %s3680_s15, 2 }
  0x2b   : > { %s3799_s17 = scalar_select %p25_p1, %s3676_s14, %s27_s25  }
  0x2c   : > { %p36_p8 = por %p35_p4, %p34_p2  ;;  %p4338_p10 = scmp.eq.s32.totalorder %s3730_s16, 1 }
  0x2d   : > { %s148_s23 = sand.u32 1, %s3676_s14   ;;  %s2673_s27 = sshll.u32 %s3680_s15, 13 }
  0x2e   : > { %p3803_p12 = por %p4338_p10, %p34_p2  ;;  %s2460_s28 = sshll.u32 %s148_s23, 9 }
  0x2f   : > { %s3812_s4 = scalar_lea.hbm %s4327_s0, %s2673_s27  ;;  %s152_s22 = scalar_lea.vmem [#allocation2], %s2460_s28 }
  0x30   : > { %s159_s25 = sshll.u32 %s152_s22, 4  ;;  %p3814_p11 = pnand %p3439_p6, %p36_p8  ;;  %s3818_s25 = int_to_ptr.vmem [resolvable:$true] %s159_s25 }
  0x31   : > { %s3820_s5 = scalar_lea.sflag [#allocation3], %s148_s23  ;;  %s3580_s6 = scalar_lea.hbm %s3812_s4, 8192 }
  0x32   : > { %p3581_p13 = scmp.ne.s32.totalorder %s3812_s4, %s3580_s6  ;;  %p3582_p0 = pneg %p3814_p11 }
  0x33   : > { %s3585_s11 = scalar_lea.hbm %s4327_s0, 16384  ;;  %p3586_p7 = scmp.lt.u32.totalorder %s3812_s4, %s4327_s0 }
  0x34   : > { %p3583_p3 = pnand %p3582_p0, %p3581_p13  ;;  %p3587_p9 = scmp.lt.u32.totalorder %s3585_s11, %s3580_s6 }
  0x35   : > { %p3589_p2 = scmp.lt.u32.totalorder %s3580_s6, %s3812_s4 }
  0x36   : > { %p3584_p5 = pneg %p3583_p3  ;;  %p3588_p1 = por %p3587_p9, %p3586_p7 }
  0x38   : > { %p3590_p4 = por %p3589_p2, %p3588_p1 }
  0x3a   : > { %p3591_p6 = pnand %p3590_p4, %p3584_p5 }
  0x3c   : > { %3594 = shalt.err (!%p3591_p6)
}
  0x3d   : > { %s3595_s23 = scalar_lea.vmem %s3818_s25, 8192  ;;  %s3685_s29 = smov [#allocation2]  }
  0x3e   : > { %p3596_p8 = scmp.ne.s32.totalorder %s3818_s25, %s3595_s23  ;;  %s3600_s30 = sshll.u32 %s3685_s29, 4  ;;  %s3601_s30 = int_to_ptr.vmem [resolvable:$false] %s3600_s30 }
  0x3f   : > { %s3602_s22 = scalar_lea.vmem %s3601_s30, 16384  ;;  %p3603_p3 = scmp.lt.s32.totalorder %s3818_s25, %s3601_s30 }
  0x40   : > { %p3598_p10 = pnand %p3596_p8, %p3582_p0  ;;  %p3604_p7 = scmp.lt.s32.totalorder %s3602_s22, %s3595_s23 }
  0x42   : > { %p3599_p13 = pneg %p3598_p10  ;;  %p3605_p9 = por %p3604_p7, %p3603_p3 }
  0x44   : > { %p3606_p1 = pnand %p3605_p9, %p3599_p13 }
  0x46   : > { %3609 = shalt.err (!%p3606_p1)
}
  0x47   : > { %3433 = dma.hbm_to_vmem [thread:$0]  (!%p3814_p11), %s3812_s4, 8192, %s3818_s25, %s3820_s5, %s3683_s8, %s3683_s8, %s3684_s9  }
  0x48   : > { %p4341_p0 = scmp.ne.s32.totalorder %s4336_s20, 0 }
  0x49   : > { %s3854_s6 = sand.u32 (!%p4341_p0), 1, %s3672_s13   ;;  %p4342_p5 = scmp.ne.s32.totalorder (!%p4341_p0), %s4334_s18, 0 }
  0x4a   : > { %171 = sbr.rel (%p4341_p0) target bundleno = 493 (0x1ed), region = 32  ;;  %s2464_s7 = sshll.u32 (!%p4341_p0), %s3854_s6, 9 }
  0x4b   : > { %s174_s10 = scalar_lea.sflag (!%p4341_p0), [#allocation3], %s3854_s6  ;;  %s3860_s26 = scalar_lea.vmem (!%p4341_p0), [#allocation2], %s2464_s7 }
  0x51   : > { %3655 = dma.done.wait (%p4342_p5), %s174_s10, 8192  }
  0x52   : > { %3657 = vsyncadd (%p4342_p5), %s174_s10, 4294959104  ;;  %p4343_p11 = scmp.eq.s32.totalorder %s3730_s16, 0 }
  0x54   : > { %3659 = dma.done.wait (%p4343_p11), [#allocation6], 1024   ;;  %p4344_p2 = pmov %p4343_p11 }
  0x55   : > { %v3479_v0 = vld [vmem:[#allocation5] sm:$0xff]   ;;  %v3480_v1 = vld [vmem:[#allocation5 + $0x8] sm:$0xff]   ;;  %v3481_v2 = vld [vmem:[#allocation5 + $0x10] sm:$0xff]   ;;  %s3953_s8 = scalar_lea.vmem [#allocation7], %s2464_s7  ;;  %s2802_s25 = sshll.u32 %s3730_s16, 13 }
  0x56   : > { %3661 = vsyncadd (%p4344_p2), [#allocation6], 4294966272  ;;  %3258 = vmatprep.subr.bf16.mxu0 %v3479_v0  ;;  %3402 = vmatprep.subr.bf16.mxu1 %v3479_v0  ;;  %v3482_v3 = vld [vmem:[#allocation5 + $0x18] sm:$0xff]   ;;  %v3487_v4 = vld [vmem:[%s3860_s26] sm:$0xff]   ;;  %s2373_s5 = sshll.u32 %s3953_s8, 4  ;;  %s4277_s27 = scalar_lea.hbm %s4330_s3, %s2802_s25  ;;  %s4279_s5 = int_to_ptr.vmem [resolvable:$true] %s2373_s5 }
  0x57   : > { %3259 = vmatpush3.bf16.msra.mxu0 %v3479_v0  ;;  %3410 = vmatpush3.bf16.msra.mxu1 %v3479_v0  ;;  %v3488_v5 = vld [vmem:[%s3860_s26 + $0x100] sm:$0xff]   ;;  %v3484_v7 = vld [vmem:[#allocation5 + $0x28] sm:$0xff]   ;;  %v3485_v8 = vld [vmem:[#allocation5 + $0x30] sm:$0xff]   ;;  %s2360_s28 = scalar_lea.sflag [#allocation4], %s3854_s6  ;;  %s3610_s23 = scalar_lea.vmem %s4279_s5, 8192 }
  0x58   : > { %3260 = vmatprep.subr.bf16.mxu0 %v3480_v1  ;;  %3403 = vmatprep.subr.bf16.mxu1 %v3480_v1  ;;  %v3483_v6 = vld [vmem:[#allocation5 + $0x20] sm:$0xff]   ;;  %v3486_v9 = vld [vmem:[#allocation5 + $0x38] sm:$0xff]   ;;  %v3489_v10 = vld [vmem:[%s3860_s26 + $0x8] sm:$0xff]   ;;  %p3611_p4 = scmp.ne.s32.totalorder %s4279_s5, %s3610_s23  ;;  %s3686_s29 = smov [#allocation7]  }
  0x59   : > { %3274 = vmatprep.mubr.bf16.mxu0 %v3487_v4  ;;  %3338 = vmatprep.mubr.bf16.mxu1 %v3488_v5  ;;  %v3490_v11 = vld [vmem:[%s3860_s26 + $0x108] sm:$0xff]   ;;  %v3491_v12 = vld [vmem:[%s3860_s26 + $0x10] sm:$0xff]   ;;  %v3493_v14 = vld [vmem:[%s3860_s26 + $0x18] sm:$0xff]   ;;  %s3614_s30 = sshll.u32 %s3686_s29, 4  ;;  %s3615_s30 = int_to_ptr.vmem [resolvable:$false] %s3614_s30 }
  0x5a   : > { %v3492_v13 = vld [vmem:[%s3860_s26 + $0x110] sm:$0xff]   ;;  %v3494_v15 = vld [vmem:[%s3860_s26 + $0x118] sm:$0xff]   ;;  %v3495_v16 = vld [vmem:[%s3860_s26 + $0x20] sm:$0xff]   ;;  %p3612_p6 = pnand %p3611_p4, %p3803_p12  ;;  %s3616_s22 = scalar_lea.vmem %s3615_s30, 16384 }
  0x5b   : > { %3261 = vmatpush3.bf16.msra.mxu0 %v3480_v1  ;;  %3411 = vmatpush3.bf16.msra.mxu1 %v3480_v1  ;;  %v3496_v17 = vld [vmem:[%s3860_s26 + $0x120] sm:$0xff]   ;;  %v3497_v18 = vld [vmem:[%s3860_s26 + $0x28] sm:$0xff]   ;;  %v3499_v20 = vld [vmem:[%s3860_s26 + $0x30] sm:$0xff]   ;;  %p3617_p10 = scmp.lt.s32.totalorder %s4279_s5, %s3615_s30  ;;  %p3618_p13 = scmp.lt.s32.totalorder %s3616_s22, %s3610_s23 }
  0x5c   : > { %3262 = vmatprep.subr.bf16.mxu0 %v3481_v2  ;;  %3404 = vmatprep.subr.bf16.mxu1 %v3481_v2  ;;  %v3498_v19 = vld [vmem:[%s3860_s26 + $0x128] sm:$0xff]   ;;  %v3500_v21 = vld [vmem:[%s3860_s26 + $0x130] sm:$0xff]   ;;  %v3501_v22 = vld [vmem:[%s3860_s26 + $0x38] sm:$0xff]   ;;  %p3613_p8 = pneg %p3612_p6 }
  0x5d   : > { %v3502_v23 = vld [vmem:[%s3860_s26 + $0x138] sm:$0xff]   ;;  %v3503_v24 = vld [vmem:[%s3860_s26 + $0x40] sm:$0xff]   ;;  %v3505_v26 = vld [vmem:[%s3860_s26 + $0x48] sm:$0xff]   ;;  %p3619_p3 = por %p3618_p13, %p3617_p10 }
  0x5e   : > { %v3504_v25 = vld [vmem:[%s3860_s26 + $0x140] sm:$0xff]   ;;  %v3506_v27 = vld [vmem:[%s3860_s26 + $0x148] sm:$0xff]   ;;  %v3507_v28 = vld [vmem:[%s3860_s26 + $0x50] sm:$0xff]  }
  0x5f   : > { %3263 = vmatpush3.bf16.msra.mxu0 %v3481_v2  ;;  %3412 = vmatpush3.bf16.msra.mxu1 %v3481_v2  ;;  %v3508_v29 = vld [vmem:[%s3860_s26 + $0x150] sm:$0xff]   ;;  %v3509_v30 = vld [vmem:[%s3860_s26 + $0x58] sm:$0xff]   ;;  %v3511_v32 = vld [vmem:[%s3860_s26 + $0x60] sm:$0xff]   ;;  %p3620_p7 = pnand %p3619_p3, %p3613_p8 }
  0x60   : > { %3264 = vmatprep.subr.bf16.mxu0 %v3482_v3  ;;  %3405 = vmatprep.subr.bf16.mxu1 %v3482_v3  ;;  %v3510_v31 = vld [vmem:[%s3860_s26 + $0x158] sm:$0xff]   ;;  %v3512_v33 = vld [vmem:[%s3860_s26 + $0x160] sm:$0xff]   ;;  %v3513_v34 = vld [vmem:[%s3860_s26 + $0x68] sm:$0xff]  }
  0x61   : > { %v3514_v35 = vld [vmem:[%s3860_s26 + $0x168] sm:$0xff]   ;;  %v3515_v36 = vld [vmem:[%s3860_s26 + $0x70] sm:$0xff]   ;;  %v3517_v38 = vld [vmem:[%s3860_s26 + $0x78] sm:$0xff]  }
  0x62   : > { %v3516_v37 = vld [vmem:[%s3860_s26 + $0x170] sm:$0xff]   ;;  %v3518_v39 = vld [vmem:[%s3860_s26 + $0x178] sm:$0xff]   ;;  %v3519_v40 = vld [vmem:[%s3860_s26 + $0x80] sm:$0xff]  }
  0x63   : > { %3265 = vmatpush3.bf16.msra.mxu0 %v3482_v3  ;;  %3413 = vmatpush3.bf16.msra.mxu1 %v3482_v3  ;;  %v3520_v41 = vld [vmem:[%s3860_s26 + $0x180] sm:$0xff]   ;;  %v3521_v42 = vld [vmem:[%s3860_s26 + $0x88] sm:$0xff]   ;;  %v3523_v44 = vld [vmem:[%s3860_s26 + $0x90] sm:$0xff]  }
  0x64   : > { %3266 = vmatprep.subr.bf16.mxu0 %v3483_v6  ;;  %3406 = vmatprep.subr.bf16.mxu1 %v3483_v6  ;;  %v3522_v43 = vld [vmem:[%s3860_s26 + $0x188] sm:$0xff]   ;;  %v3524_v45 = vld [vmem:[%s3860_s26 + $0x190] sm:$0xff]   ;;  %v3525_v46 = vld [vmem:[%s3860_s26 + $0x98] sm:$0xff]  }
  0x65   : > { %v3526_v47 = vld [vmem:[%s3860_s26 + $0x198] sm:$0xff]   ;;  %v3527_v48 = vld [vmem:[%s3860_s26 + $0xa0] sm:$0xff]   ;;  %v3529_v50 = vld [vmem:[%s3860_s26 + $0xa8] sm:$0xff]  }
  0x66   : > { %v3528_v49 = vld [vmem:[%s3860_s26 + $0x1a0] sm:$0xff]   ;;  %v3530_v51 = vld [vmem:[%s3860_s26 + $0x1a8] sm:$0xff]   ;;  %v3531_v52 = vld [vmem:[%s3860_s26 + $0xb0] sm:$0xff]  }
  0x67   : > { %3267 = vmatpush3.bf16.msra.mxu0 %v3483_v6  ;;  %3414 = vmatpush3.bf16.msra.mxu1 %v3483_v6  ;;  %v3532_v53 = vld [vmem:[%s3860_s26 + $0x1b0] sm:$0xff]   ;;  %v3533_v54 = vld [vmem:[%s3860_s26 + $0xb8] sm:$0xff]   ;;  %v3535_v56 = vld [vmem:[%s3860_s26 + $0xc0] sm:$0xff]  }
  0x68   : > { %3268 = vmatprep.subr.bf16.mxu0 %v3484_v7  ;;  %3407 = vmatprep.subr.bf16.mxu1 %v3484_v7  ;;  %v3534_v55 = vld [vmem:[%s3860_s26 + $0x1b8] sm:$0xff]   ;;  %v3536_v57 = vld [vmem:[%s3860_s26 + $0x1c0] sm:$0xff]   ;;  %v3537_v58 = vld [vmem:[%s3860_s26 + $0xc8] sm:$0xff]  }
  0x69   : > { %v3538_v59 = vld [vmem:[%s3860_s26 + $0x1c8] sm:$0xff]   ;;  %v3539_v60 = vld [vmem:[%s3860_s26 + $0xd0] sm:$0xff]   ;;  %v3541_v62 = vld [vmem:[%s3860_s26 + $0xd8] sm:$0xff]  }
  0x6a   : > { %v3540_v61 = vld [vmem:[%s3860_s26 + $0x1d0] sm:$0xff]   ;;  %v3542_v63 = vld [vmem:[%s3860_s26 + $0x1d8] sm:$0xff]   ;;  %v3543_v0 = vld [vmem:[%s3860_s26 + $0xe0] sm:$0xff]  }
  0x6b   : > { %3269 = vmatpush3.bf16.msra.mxu0 %v3484_v7  ;;  %3415 = vmatpush3.bf16.msra.mxu1 %v3484_v7  ;;  %v3544_v1 = vld [vmem:[%s3860_s26 + $0x1e0] sm:$0xff]   ;;  %v3545_v2 = vld [vmem:[%s3860_s26 + $0xe8] sm:$0xff]   ;;  %v3547_v4 = vld [vmem:[%s3860_s26 + $0xf0] sm:$0xff]  }
  0x6c   : > { %3270 = vmatprep.subr.bf16.mxu0 %v3485_v8  ;;  %3408 = vmatprep.subr.bf16.mxu1 %v3485_v8  ;;  %v3546_v3 = vld [vmem:[%s3860_s26 + $0x1e8] sm:$0xff]   ;;  %v3548_v5 = vld [vmem:[%s3860_s26 + $0x1f0] sm:$0xff]   ;;  %v3549_v6 = vld [vmem:[%s3860_s26 + $0xf8] sm:$0xff]  }
  0x6d   : > { %v3550_v7 = vld [vmem:[%s3860_s26 + $0x1f8] sm:$0xff]  }
  0x6f   : > { %3271 = vmatpush3.bf16.msra.mxu0 %v3485_v8  ;;  %3416 = vmatpush3.bf16.msra.mxu1 %v3485_v8  ;;  %v3937_v8 = vld [vmem:[%s4329_s2] ss:$0 sm:$0xff] }
  0x70   : > { %3272 = vmatprep.subr.bf16.mxu0 %v3486_v9  ;;  %3409 = vmatprep.subr.bf16.mxu1 %v3486_v9 }
  0x73   : > { %3273 = vmatpush3.bf16.msra.mxu0 %v3486_v9  ;;  %3417 = vmatpush3.bf16.msra.mxu1 %v3486_v9 }
  0x76   : > { %3275 = vmatmul.mubr.bf16.vlgmr.msra.gmra.mrb[0].mxu0 %v3489_v10  ;;  %3339 = vmatmul.mubr.bf16.vlgmr.msra.gmra.mrb[0].mxu1 %v3490_v11 }
  0x77   : > { %3278 = vmatprep.mubr.bf16.mxu0 %v3491_v12  ;;  %3342 = vmatprep.mubr.bf16.mxu1 %v3492_v13 }
  0x7e   : > { %3279 = vmatmul.mubr.bf16.gmra.mrb[4].mxu0 %v3493_v14  ;;  %3343 = vmatmul.mubr.bf16.gmra.mrb[4].mxu1 %v3494_v15 }
  0x7f   : > { %3282 = vmatprep.mubr.bf16.mxu0 %v3495_v16  ;;  %3346 = vmatprep.mubr.bf16.mxu1 %v3496_v17 }
  0x86   : > { %3283 = vmatmul.mubr.bf16.gmra.mrb[8].mxu0 %v3497_v18  ;;  %3347 = vmatmul.mubr.bf16.gmra.mrb[8].mxu1 %v3498_v19 }
  0x87   : > { %3286 = vmatprep.mubr.bf16.mxu0 %v3499_v20  ;;  %3350 = vmatprep.mubr.bf16.mxu1 %v3500_v21 }
  0x8e   : > { %3287 = vmatmul.mubr.bf16.gmra.mrb[12].mxu0 %v3501_v22  ;;  %3351 = vmatmul.mubr.bf16.gmra.mrb[12].mxu1 %v3502_v23 }
  0x8f   : > { %3290 = vmatprep.mubr.bf16.mxu0 %v3503_v24  ;;  %3354 = vmatprep.mubr.bf16.mxu1 %v3504_v25 }
  0x96   : > { %3291 = vmatmul.mubr.bf16.gmra.mrb[16].mxu0 %v3505_v26  ;;  %3355 = vmatmul.mubr.bf16.gmra.mrb[16].mxu1 %v3506_v27 }
  0x97   : > { %3294 = vmatprep.mubr.bf16.mxu0 %v3507_v28  ;;  %3358 = vmatprep.mubr.bf16.mxu1 %v3508_v29 }
  0x9e   : > { %3295 = vmatmul.mubr.bf16.gmra.mrb[20].mxu0 %v3509_v30  ;;  %3359 = vmatmul.mubr.bf16.gmra.mrb[20].mxu1 %v3510_v31 }
  0x9f   : > { %3298 = vmatprep.mubr.bf16.mxu0 %v3511_v32  ;;  %3362 = vmatprep.mubr.bf16.mxu1 %v3512_v33 }
  0xa6   : > { %3299 = vmatmul.mubr.bf16.gmra.mrb[24].mxu0 %v3513_v34  ;;  %3363 = vmatmul.mubr.bf16.gmra.mrb[24].mxu1 %v3514_v35 }
  0xa7   : > { %3302 = vmatprep.mubr.bf16.mxu0 %v3515_v36  ;;  %3366 = vmatprep.mubr.bf16.mxu1 %v3516_v37 }
  0xae   : > { %3303 = vmatmul.mubr.bf16.gmra.mrb[28].mxu0 %v3517_v38  ;;  %3367 = vmatmul.mubr.bf16.gmra.mrb[28].mxu1 %v3518_v39 }
  0xaf   : > { %3306 = vmatprep.mubr.bf16.mxu0 %v3519_v40  ;;  %3370 = vmatprep.mubr.bf16.mxu1 %v3520_v41 }
  0xb6   : > { %3307 = vmatmul.mubr.bf16.gmra.mrb[32].mxu0 %v3521_v42  ;;  %3371 = vmatmul.mubr.bf16.gmra.mrb[32].mxu1 %v3522_v43 }
  0xb7   : > { %3310 = vmatprep.mubr.bf16.mxu0 %v3523_v44  ;;  %3374 = vmatprep.mubr.bf16.mxu1 %v3524_v45 }
  0xbe   : > { %3311 = vmatmul.mubr.bf16.gmra.mrb[36].mxu0 %v3525_v46  ;;  %3375 = vmatmul.mubr.bf16.gmra.mrb[36].mxu1 %v3526_v47 }
  0xbf   : > { %3314 = vmatprep.mubr.bf16.mxu0 %v3527_v48  ;;  %3378 = vmatprep.mubr.bf16.mxu1 %v3528_v49 }
  0xc6   : > { %3315 = vmatmul.mubr.bf16.gmra.mrb[40].mxu0 %v3529_v50  ;;  %3379 = vmatmul.mubr.bf16.gmra.mrb[40].mxu1 %v3530_v51 }
  0xc7   : > { %3318 = vmatprep.mubr.bf16.mxu0 %v3531_v52  ;;  %3382 = vmatprep.mubr.bf16.mxu1 %v3532_v53 }
  0xce   : > { %3319 = vmatmul.mubr.bf16.gmra.mrb[44].mxu0 %v3533_v54  ;;  %3383 = vmatmul.mubr.bf16.gmra.mrb[44].mxu1 %v3534_v55 }
  0xcf   : > { %3322 = vmatprep.mubr.bf16.mxu0 %v3535_v56  ;;  %3386 = vmatprep.mubr.bf16.mxu1 %v3536_v57 }
  0xd6   : > { %3323 = vmatmul.mubr.bf16.gmra.mrb[48].mxu0 %v3537_v58  ;;  %3387 = vmatmul.mubr.bf16.gmra.mrb[48].mxu1 %v3538_v59 }
  0xd7   : > { %3326 = vmatprep.mubr.bf16.mxu0 %v3539_v60  ;;  %3390 = vmatprep.mubr.bf16.mxu1 %v3540_v61 }
  0xde   : > { %3327 = vmatmul.mubr.bf16.gmra.mrb[52].mxu0 %v3541_v62  ;;  %3391 = vmatmul.mubr.bf16.gmra.mrb[52].mxu1 %v3542_v63 }
  0xdf   : > { %3330 = vmatprep.mubr.bf16.mxu0 %v3543_v0  ;;  %3394 = vmatprep.mubr.bf16.mxu1 %v3544_v1 }
  0xe6   : > { %3331 = vmatmul.mubr.bf16.gmra.mrb[56].mxu0 %v3545_v2  ;;  %3395 = vmatmul.mubr.bf16.gmra.mrb[56].mxu1 %v3546_v3 }
  0xe7   : > { %3334 = vmatprep.mubr.bf16.mxu0 %v3547_v4  ;;  %3398 = vmatprep.mubr.bf16.mxu1 %v3548_v5 }
  0xee   : > { %3335 = vmatmul.mubr.bf16.gmra.mrb[60].mxu0 %v3549_v6  ;;  %3399 = vmatmul.mubr.bf16.gmra.mrb[60].mxu1 %v3550_v7 }
 0x149   : > { %v3276_v9 = vpop.f32.mrb[0].mxu0  ;;  %v3340_v10 = vpop.f32.mrb[0].mxu1 }
 0x14a   : > { %v833_v11 = vadd.f32 %v3276_v9, %v3937_v8  ;;  %v1089_v12 = vadd.f32 %v3340_v10, %v3937_v8  ;;  %v824_v13 = vpop.f32.mrb[1].mxu0  ;;  %v1080_v14 = vpop.f32.mrb[1].mxu1 }
 0x14b   : > { %v825_v15 = vadd.f32 %v3937_v8, %v824_v13  ;;  %v1081_v16 = vadd.f32 %v3937_v8, %v1080_v14  ;;  %v3277_v17 = vpop.f32.mrb[2].mxu0  ;;  %v3341_v18 = vpop.f32.mrb[2].mxu1 }
 0x14c   : > { %vm1337_vm0 = vcmp.gt.f32.partialorder %v833_v11, 0.0  ;;  %v1465_v19 = vmul.f32 0.2, %v833_v11  ;;  %vm1401_vm1 = vcmp.gt.f32.partialorder %v1089_v12, 0.0  ;;  %v1529_v20 = vmul.f32 0.2, %v1089_v12 }
 0x14d   : > { %vm1335_vm2 = vcmp.gt.f32.partialorder %v825_v15, 0.0  ;;  %v1463_v21 = vmul.f32 0.2, %v825_v15  ;;  %vm1399_vm3 = vcmp.gt.f32.partialorder %v1081_v16, 0.0  ;;  %v1527_v22 = vmul.f32 0.2, %v1081_v16 }
 0x14e   : > { %v836_v23 = vadd.f32 %v3277_v17, %v3937_v8  ;;  %v1092_v24 = vadd.f32 %v3341_v18, %v3937_v8  ;;  %v827_v25 = vpop.f32.mrb[3].mxu0  ;;  %v1083_v26 = vpop.f32.mrb[3].mxu1  ;;  %v1593_v27 = vsel %vm1337_vm0, %v833_v11, %v1465_v19  ;;  %v1657_v28 = vsel %vm1401_vm1, %v1089_v12, %v1529_v20 }
 0x14f   : > { %v828_v29 = vadd.f32 %v3937_v8, %v827_v25  ;;  %v1084_v30 = vadd.f32 %v3937_v8, %v1083_v26  ;;  %v1591_v35 = vsel %vm1335_vm2, %v825_v15, %v1463_v21  ;;  %v1655_v36 = vsel %vm1399_vm3, %v1081_v16, %v1527_v22 }
 0x150   : > { %vm1338_vm4 = vcmp.gt.f32.partialorder %v836_v23, 0.0  ;;  %v1466_v31 = vmul.f32 0.2, %v836_v23  ;;  %vm1402_vm5 = vcmp.gt.f32.partialorder %v1092_v24, 0.0  ;;  %v1530_v32 = vmul.f32 0.2, %v1092_v24 }
 0x151   : > { %vm1336_vm6 = vcmp.gt.f32.partialorder %v828_v29, 0.0  ;;  %v1464_v33 = vmul.f32 0.2, %v828_v29  ;;  %vm1400_vm7 = vcmp.gt.f32.partialorder %v1084_v30, 0.0  ;;  %v1528_v34 = vmul.f32 0.2, %v1084_v30 }
 0x152   : > { %v1594_v37 = vsel %vm1338_vm4, %v836_v23, %v1466_v31  ;;  %v1658_v38 = vsel %vm1402_vm5, %v1092_v24, %v1530_v32  ;;  %v3280_v39 = vpop.f32.mrb[4].mxu0  ;;  %v3344_v40 = vpop.f32.mrb[4].mxu1 }
 0x153   : > { %v2811_v41 = vpack.c.bf16 %v1594_v37, %v1593_v27  ;;  %v2971_v42 = vpack.c.bf16 %v1658_v38, %v1657_v28  ;;  %v1592_v43 = vsel %vm1336_vm6, %v828_v29, %v1464_v33  ;;  %v1656_v44 = vsel %vm1400_vm7, %v1084_v30, %v1528_v34  ;;  %v840_v45 = vpop.f32.mrb[5].mxu0  ;;  %v1096_v46 = vpop.f32.mrb[5].mxu1 }
 0x154   : > { %v2806_v47 = vpack.c.bf16 %v1592_v43, %v1591_v35  ;;  %v2966_v48 = vpack.c.bf16 %v1656_v44, %v1655_v36  ;;  %v849_v49 = vadd.f32 %v3280_v39, %v3937_v8  ;;  %v1105_v50 = vadd.f32 %v3344_v40, %v3937_v8  ;;  %v3281_v51 = vpop.f32.mrb[6].mxu0  ;;  %v3345_v52 = vpop.f32.mrb[6].mxu1 }
 0x155   : > { %3123 = vst [vmem:[%s3953_s8 + $0x8] sm:$0xff] %v2811_v41   ;;  %3155 = vst [vmem:[%s3953_s8 + $0x108] sm:$0xff] %v2971_v42   ;;  %v841_v53 = vadd.f32 %v3937_v8, %v840_v45  ;;  %v1097_v54 = vadd.f32 %v3937_v8, %v1096_v46  ;;  %v852_v55 = vadd.f32 %v3281_v51, %v3937_v8  ;;  %v843_v57 = vpop.f32.mrb[7].mxu0  ;;  %v1099_v58 = vpop.f32.mrb[7].mxu1 }
 0x156   : > { %v1108_v56 = vadd.f32 %v3345_v52, %v3937_v8  ;;  %2807 = vst [vmem:[%s3953_s8] sm:$0xff] %v2806_v47   ;;  %3154 = vst [vmem:[%s3953_s8 + $0x100] sm:$0xff] %v2966_v48   ;;  %vm1341_vm8 = vcmp.gt.f32.partialorder %v849_v49, 0.0  ;;  %v1469_v59 = vmul.f32 0.2, %v849_v49  ;;  %vm1405_vm9 = vcmp.gt.f32.partialorder %v1105_v50, 0.0 }
 0x157   : > { %v1533_v60 = vmul.f32 0.2, %v1105_v50  ;;  %vm1339_vm10 = vcmp.gt.f32.partialorder %v841_v53, 0.0  ;;  %v1467_v61 = vmul.f32 0.2, %v841_v53  ;;  %vm1403_vm11 = vcmp.gt.f32.partialorder %v1097_v54, 0.0 }
 0x158   : > { %v1531_v62 = vmul.f32 0.2, %v1097_v54  ;;  %v1597_v63 = vsel %vm1341_vm8, %v849_v49, %v1469_v59  ;;  %vm1342_vm12 = vcmp.gt.f32.partialorder %v852_v55, 0.0  ;;  %v1470_v1 = vmul.f32 0.2, %v852_v55 }
 0x159   : > { %v1661_v0 = vsel %vm1405_vm9, %v1105_v50, %v1533_v60  ;;  %v1595_v2 = vsel %vm1339_vm10, %v841_v53, %v1467_v61  ;;  %vm1406_vm13 = vcmp.gt.f32.partialorder %v1108_v56, 0.0  ;;  %v1534_v4 = vmul.f32 0.2, %v1108_v56  ;;  %v3284_v5 = vpop.f32.mrb[8].mxu0  ;;  %v3348_v6 = vpop.f32.mrb[8].mxu1 }
 0x15a   : > { %v1659_v3 = vsel %vm1403_vm11, %v1097_v54, %v1531_v62  ;;  %v1598_v7 = vsel %vm1342_vm12, %v852_v55, %v1470_v1  ;;  %v844_v9 = vadd.f32 %v3937_v8, %v843_v57  ;;  %v1100_v10 = vadd.f32 %v3937_v8, %v1099_v58  ;;  %v856_v12 = vpop.f32.mrb[9].mxu0  ;;  %v1112_v13 = vpop.f32.mrb[9].mxu1 }
 0x15b   : > { %v865_v11 = vadd.f32 %v3284_v5, %v3937_v8  ;;  %v2821_v14 = vpack.c.bf16 %v1598_v7, %v1597_v63  ;;  %v1662_v15 = vsel %vm1406_vm13, %v1108_v56, %v1534_v4  ;;  %v1121_v16 = vadd.f32 %v3348_v6, %v3937_v8  ;;  %v3285_v18 = vpop.f32.mrb[10].mxu0  ;;  %v3349_v19 = vpop.f32.mrb[10].mxu1 }
 0x15c   : > { %v857_v17 = vadd.f32 %v3937_v8, %v856_v12  ;;  %v2981_v20 = vpack.c.bf16 %v1662_v15, %v1661_v0  ;;  %vm1340_vm14 = vcmp.gt.f32.partialorder %v844_v9, 0.0  ;;  %v1468_v21 = vmul.f32 0.2, %v844_v9  ;;  %v859_v22 = vpop.f32.mrb[11].mxu0  ;;  %v1115_v23 = vpop.f32.mrb[11].mxu1 }
 0x15d   : > { %vm1404_vm15 = vcmp.gt.f32.partialorder %v1100_v10, 0.0  ;;  %3125 = vst [vmem:[%s3953_s8 + $0x18] sm:$0xff] %v2821_v14   ;;  %v1532_v24 = vmul.f32 0.2, %v1100_v10  ;;  %vm1345_vm0 = vcmp.gt.f32.partialorder %v865_v11, 0.0  ;;  %vm1409_vm1 = vcmp.gt.f32.partialorder %v1121_v16, 0.0 }
 0x15e   : > { %v1473_v25 = vmul.f32 0.2, %v865_v11  ;;  %3157 = vst [vmem:[%s3953_s8 + $0x118] sm:$0xff] %v2981_v20   ;;  %v1596_v26 = vsel %vm1340_vm14, %v844_v9, %v1468_v21  ;;  %v1537_v27 = vmul.f32 0.2, %v1121_v16  ;;  %vm1343_vm2 = vcmp.gt.f32.partialorder %v857_v17, 0.0 }
 0x15f   : > { %v1471_v28 = vmul.f32 0.2, %v857_v17  ;;  %v2816_v29 = vpack.c.bf16 %v1596_v26, %v1595_v2  ;;  %v1660_v30 = vsel %vm1404_vm15, %v1100_v10, %v1532_v24  ;;  %v1113_v32 = vadd.f32 %v3937_v8, %v1112_v13 }
 0x160   : > { %v1601_v31 = vsel %vm1345_vm0, %v865_v11, %v1473_v25  ;;  %v2976_v33 = vpack.c.bf16 %v1660_v30, %v1659_v3  ;;  %v1665_v34 = vsel %vm1409_vm1, %v1121_v16, %v1537_v27  ;;  %v868_v36 = vadd.f32 %v3285_v18, %v3937_v8 }
 0x161   : > { %v1599_v35 = vsel %vm1343_vm2, %v857_v17, %v1471_v28  ;;  %3124 = vst [vmem:[%s3953_s8 + $0x10] sm:$0xff] %v2816_v29   ;;  %vm1407_vm3 = vcmp.gt.f32.partialorder %v1113_v32, 0.0  ;;  %v1535_v37 = vmul.f32 0.2, %v1113_v32  ;;  %v1124_v38 = vadd.f32 %v3349_v19, %v3937_v8  ;;  %v3288_v40 = vpop.f32.mrb[12].mxu0  ;;  %v3352_v41 = vpop.f32.mrb[12].mxu1 }
 0x162   : > { %v860_v39 = vadd.f32 %v3937_v8, %v859_v22  ;;  %3156 = vst [vmem:[%s3953_s8 + $0x110] sm:$0xff] %v2976_v33   ;;  %vm1346_vm4 = vcmp.gt.f32.partialorder %v868_v36, 0.0  ;;  %v1474_v42 = vmul.f32 0.2, %v868_v36  ;;  %v1116_v43 = vadd.f32 %v3937_v8, %v1115_v23  ;;  %v872_v45 = vpop.f32.mrb[13].mxu0  ;;  %v1128_v46 = vpop.f32.mrb[13].mxu1 }
 0x163   : > { %v881_v44 = vadd.f32 %v3288_v40, %v3937_v8  ;;  %v1663_v47 = vsel %vm1407_vm3, %v1113_v32, %v1535_v37  ;;  %vm1410_vm5 = vcmp.gt.f32.partialorder %v1124_v38, 0.0  ;;  %v1538_v48 = vmul.f32 0.2, %v1124_v38  ;;  %v3289_v49 = vpop.f32.mrb[14].mxu0  ;;  %v3353_v50 = vpop.f32.mrb[14].mxu1 }
 0x164   : > { %vm1344_vm6 = vcmp.gt.f32.partialorder %v860_v39, 0.0  ;;  %v1602_v51 = vsel %vm1346_vm4, %v868_v36, %v1474_v42  ;;  %v1472_v52 = vmul.f32 0.2, %v860_v39  ;;  %vm1408_vm7 = vcmp.gt.f32.partialorder %v1116_v43, 0.0  ;;  %v875_v54 = vpop.f32.mrb[15].mxu0  ;;  %v1131_v58 = vpop.f32.mrb[15].mxu1 }
 0x165   : > { %v1536_v53 = vmul.f32 0.2, %v1116_v43  ;;  %v2831_v55 = vpack.c.bf16 %v1602_v51, %v1601_v31  ;;  %v1666_v56 = vsel %vm1410_vm5, %v1124_v38, %v1538_v48  ;;  %vm1349_vm8 = vcmp.gt.f32.partialorder %v881_v44, 0.0 }
 0x166   : > { %v1477_v57 = vmul.f32 0.2, %v881_v44  ;;  %v2991_v59 = vpack.c.bf16 %v1666_v56, %v1665_v34  ;;  %v1600_v60 = vsel %vm1344_vm6, %v860_v39, %v1472_v52  ;;  %v1137_v62 = vadd.f32 %v3352_v41, %v3937_v8 }
 0x167   : > { %v1664_v61 = vsel %vm1408_vm7, %v1116_v43, %v1536_v53  ;;  %3127 = vst [vmem:[%s3953_s8 + $0x28] sm:$0xff] %v2831_v55   ;;  %v2826_v63 = vpack.c.bf16 %v1600_v60, %v1599_v35  ;;  %v873_v2 = vadd.f32 %v3937_v8, %v872_v45  ;;  %v1129_v4 = vadd.f32 %v3937_v8, %v1128_v46 }
 0x168   : > { %v2986_v0 = vpack.c.bf16 %v1664_v61, %v1663_v47  ;;  %v1605_v1 = vsel %vm1349_vm8, %v881_v44, %v1477_v57  ;;  %3159 = vst [vmem:[%s3953_s8 + $0x128] sm:$0xff] %v2991_v59   ;;  %vm1413_vm9 = vcmp.gt.f32.partialorder %v1137_v62, 0.0  ;;  %v1541_v3 = vmul.f32 0.2, %v1137_v62 }
 0x169   : > { %v884_v5 = vadd.f32 %v3289_v49, %v3937_v8  ;;  %3126 = vst [vmem:[%s3953_s8 + $0x20] sm:$0xff] %v2826_v63   ;;  %vm1347_vm10 = vcmp.gt.f32.partialorder %v873_v2, 0.0  ;;  %v1475_v6 = vmul.f32 0.2, %v873_v2  ;;  %v1140_v7 = vadd.f32 %v3353_v50, %v3937_v8  ;;  %v3292_v10 = vpop.f32.mrb[16].mxu0  ;;  %v3356_v11 = vpop.f32.mrb[16].mxu1 }
 0x16a   : > { %3158 = vst [vmem:[%s3953_s8 + $0x120] sm:$0xff] %v2986_v0   ;;  %v876_v9 = vadd.f32 %v3937_v8, %v875_v54  ;;  %v1669_v12 = vsel %vm1413_vm9, %v1137_v62, %v1541_v3  ;;  %vm1411_vm11 = vcmp.gt.f32.partialorder %v1129_v4, 0.0  ;;  %v1539_v13 = vmul.f32 0.2, %v1129_v4  ;;  %v888_v14 = vpop.f32.mrb[17].mxu0  ;;  %v1144_v15 = vpop.f32.mrb[17].mxu1 }
 0x16b   : > { %vm1350_vm12 = vcmp.gt.f32.partialorder %v884_v5, 0.0  ;;  %v1603_v16 = vsel %vm1347_vm10, %v873_v2, %v1475_v6  ;;  %v1478_v17 = vmul.f32 0.2, %v884_v5  ;;  %vm1414_vm13 = vcmp.gt.f32.partialorder %v1140_v7, 0.0  ;;  %v3293_v19 = vpop.f32.mrb[18].mxu0  ;;  %v3357_v23 = vpop.f32.mrb[18].mxu1 }
 0x16c   : > { %v1542_v18 = vmul.f32 0.2, %v1140_v7  ;;  %v1667_v20 = vsel %vm1411_vm11, %v1129_v4, %v1539_v13  ;;  %vm1348_vm14 = vcmp.gt.f32.partialorder %v876_v9, 0.0  ;;  %v1476_v21 = vmul.f32 0.2, %v876_v9  ;;  %v891_v24 = vpop.f32.mrb[19].mxu0 }
 0x16d   : > { %v1132_v22 = vadd.f32 %v3937_v8, %v1131_v58  ;;  %v1606_v25 = vsel %vm1350_vm12, %v884_v5, %v1478_v17  ;;  %v897_v27 = vadd.f32 %v3292_v10, %v3937_v8  ;;  %v1153_v28 = vadd.f32 %v3356_v11, %v3937_v8  ;;  %v1147_v29 = vpop.f32.mrb[19].mxu1 }
 0x16e   : > { %v1670_v26 = vsel %vm1414_vm13, %v1140_v7, %v1542_v18  ;;  %v2841_v30 = vpack.c.bf16 %v1606_v25, %v1605_v1  ;;  %v1604_v32 = vsel %vm1348_vm14, %v876_v9, %v1476_v21  ;;  %v889_v37 = vadd.f32 %v3937_v8, %v888_v14 }
 0x16f   : > { %v3001_v31 = vpack.c.bf16 %v1670_v26, %v1669_v12  ;;  %vm1412_vm15 = vcmp.gt.f32.partialorder %v1132_v22, 0.0  ;;  %v2836_v33 = vpack.c.bf16 %v1604_v32, %v1603_v16  ;;  %v1540_v34 = vmul.f32 0.2, %v1132_v22 }
 0x170   : > { %vm1353_vm0 = vcmp.gt.f32.partialorder %v897_v27, 0.0  ;;  %v1481_v35 = vmul.f32 0.2, %v897_v27  ;;  %3129 = vst [vmem:[%s3953_s8 + $0x38] sm:$0xff] %v2841_v30   ;;  %vm1417_vm1 = vcmp.gt.f32.partialorder %v1153_v28, 0.0  ;;  %v1145_v38 = vadd.f32 %v3937_v8, %v1144_v15 }
 0x171   : > { %3161 = vst [vmem:[%s3953_s8 + $0x138] sm:$0xff] %v3001_v31   ;;  %v1545_v36 = vmul.f32 0.2, %v1153_v28  ;;  %3128 = vst [vmem:[%s3953_s8 + $0x30] sm:$0xff] %v2836_v33   ;;  %v1668_v39 = vsel %vm1412_vm15, %v1132_v22, %v1540_v34  ;;  %v900_v41 = vadd.f32 %v3293_v19, %v3937_v8  ;;  %v1156_v42 = vadd.f32 %v3357_v23, %v3937_v8  ;;  %v3296_v43 = vpop.f32.mrb[20].mxu0  ;;  %v3360_v44 = vpop.f32.mrb[20].mxu1 }
 0x172   : > { %v1609_v40 = vsel %vm1353_vm0, %v897_v27, %v1481_v35  ;;  %v2996_v45 = vpack.c.bf16 %v1668_v39, %v1667_v20  ;;  %vm1351_vm2 = vcmp.gt.f32.partialorder %v889_v37, 0.0  ;;  %v1479_v47 = vmul.f32 0.2, %v889_v37  ;;  %v904_v48 = vpop.f32.mrb[21].mxu0  ;;  %v1160_v49 = vpop.f32.mrb[21].mxu1 }
 0x173   : > { %v1673_v46 = vsel %vm1417_vm1, %v1153_v28, %v1545_v36  ;;  %vm1415_vm3 = vcmp.gt.f32.partialorder %v1145_v38, 0.0  ;;  %v1543_v50 = vmul.f32 0.2, %v1145_v38  ;;  %vm1354_vm4 = vcmp.gt.f32.partialorder %v900_v41, 0.0  ;;  %v3297_v55 = vpop.f32.mrb[22].mxu0  ;;  %v3361_v56 = vpop.f32.mrb[22].mxu1 }
 0x174   : > { %v1482_v51 = vmul.f32 0.2, %v900_v41  ;;  %3160 = vst [vmem:[%s3953_s8 + $0x130] sm:$0xff] %v2996_v45   ;;  %v1607_v52 = vsel %vm1351_vm2, %v889_v37, %v1479_v47  ;;  %vm1418_vm5 = vcmp.gt.f32.partialorder %v1156_v42, 0.0  ;;  %v1546_v53 = vmul.f32 0.2, %v1156_v42 }
 0x175   : > { %v892_v54 = vadd.f32 %v3937_v8, %v891_v24  ;;  %v1671_v57 = vsel %vm1415_vm3, %v1145_v38, %v1543_v50  ;;  %v1148_v59 = vadd.f32 %v3937_v8, %v1147_v29  ;;  %v913_v60 = vadd.f32 %v3296_v43, %v3937_v8  ;;  %v907_v61 = vpop.f32.mrb[23].mxu0  ;;  %v1163_v62 = vpop.f32.mrb[23].mxu1 }
 0x176   : > { %v1610_v58 = vsel %vm1354_vm4, %v900_v41, %v1482_v51  ;;  %v1674_v0 = vsel %vm1418_vm5, %v1156_v42, %v1546_v53  ;;  %v1169_v6 = vadd.f32 %v3360_v44, %v3937_v8  ;;  %v905_v7 = vadd.f32 %v3937_v8, %v904_v48 }
 0x177   : > { %v2851_v63 = vpack.c.bf16 %v1610_v58, %v1609_v40  ;;  %vm1352_vm6 = vcmp.gt.f32.partialorder %v892_v54, 0.0  ;;  %v1480_v1 = vmul.f32 0.2, %v892_v54  ;;  %v3011_v2 = vpack.c.bf16 %v1674_v0, %v1673_v46 }
 0x178   : > { %vm1416_vm7 = vcmp.gt.f32.partialorder %v1148_v59, 0.0  ;;  %v1544_v3 = vmul.f32 0.2, %v1148_v59  ;;  %vm1357_vm8 = vcmp.gt.f32.partialorder %v913_v60, 0.0  ;;  %v1485_v5 = vmul.f32 0.2, %v913_v60 }
 0x179   : > { %3131 = vst [vmem:[%s3953_s8 + $0x48] sm:$0xff] %v2851_v63   ;;  %v1608_v4 = vsel %vm1352_vm6, %v892_v54, %v1480_v1  ;;  %3163 = vst [vmem:[%s3953_s8 + $0x148] sm:$0xff] %v3011_v2   ;;  %v1161_v11 = vadd.f32 %v3937_v8, %v1160_v49  ;;  %v916_v12 = vadd.f32 %v3297_v55, %v3937_v8  ;;  %v3300_v13 = vpop.f32.mrb[24].mxu0  ;;  %v3364_v14 = vpop.f32.mrb[24].mxu1  ;;  %vm1421_vm9 = vcmp.gt.f32.partialorder %v1169_v6, 0.0 }
 0x17a   : > { %v2846_v9 = vpack.c.bf16 %v1608_v4, %v1607_v52  ;;  %v1672_v10 = vsel %vm1416_vm7, %v1148_v59, %v1544_v3  ;;  %v1613_v16 = vsel %vm1357_vm8, %v913_v60, %v1485_v5  ;;  %v1549_v17 = vmul.f32 0.2, %v1169_v6  ;;  %v920_v18 = vpop.f32.mrb[25].mxu0  ;;  %v1176_v19 = vpop.f32.mrb[25].mxu1 }
 0x17b   : > { %v3006_v15 = vpack.c.bf16 %v1672_v10, %v1671_v57  ;;  %vm1355_vm10 = vcmp.gt.f32.partialorder %v905_v7, 0.0  ;;  %v1483_v20 = vmul.f32 0.2, %v905_v7  ;;  %vm1419_vm11 = vcmp.gt.f32.partialorder %v1161_v11, 0.0  ;;  %v3301_v25 = vpop.f32.mrb[26].mxu0  ;;  %v3365_v26 = vpop.f32.mrb[26].mxu1 }
 0x17c   : > { %3130 = vst [vmem:[%s3953_s8 + $0x40] sm:$0xff] %v2846_v9   ;;  %v1547_v21 = vmul.f32 0.2, %v1161_v11  ;;  %v1677_v22 = vsel %vm1421_vm9, %v1169_v6, %v1549_v17  ;;  %vm1358_vm12 = vcmp.gt.f32.partialorder %v916_v12, 0.0  ;;  %v1486_v23 = vmul.f32 0.2, %v916_v12 }
 0x17d   : > { %3162 = vst [vmem:[%s3953_s8 + $0x140] sm:$0xff] %v3006_v15   ;;  %v1172_v24 = vadd.f32 %v3361_v56, %v3937_v8  ;;  %v1611_v27 = vsel %vm1355_vm10, %v905_v7, %v1483_v20  ;;  %v908_v29 = vadd.f32 %v3937_v8, %v907_v61  ;;  %v1164_v30 = vadd.f32 %v3937_v8, %v1163_v62  ;;  %v923_v31 = vpop.f32.mrb[27].mxu0  ;;  %v1179_v32 = vpop.f32.mrb[27].mxu1 }
 0x17e   : > { %v1675_v28 = vsel %vm1419_vm11, %v1161_v11, %v1547_v21  ;;  %v1614_v33 = vsel %vm1358_vm12, %v916_v12, %v1486_v23  ;;  %v929_v35 = vadd.f32 %v3300_v13, %v3937_v8  ;;  %v1185_v43 = vadd.f32 %v3364_v14, %v3937_v8 }
 0x17f   : > { %vm1422_vm13 = vcmp.gt.f32.partialorder %v1172_v24, 0.0  ;;  %v1550_v34 = vmul.f32 0.2, %v1172_v24  ;;  %v2861_v36 = vpack.c.bf16 %v1614_v33, %v1613_v16  ;;  %vm1356_vm14 = vcmp.gt.f32.partialorder %v908_v29, 0.0 }
 0x180   : > { %v1484_v37 = vmul.f32 0.2, %v908_v29  ;;  %vm1420_vm15 = vcmp.gt.f32.partialorder %v1164_v30, 0.0  ;;  %v1548_v39 = vmul.f32 0.2, %v1164_v30  ;;  %vm1361_vm0 = vcmp.gt.f32.partialorder %v929_v35, 0.0 }
 0x181   : > { %v1678_v38 = vsel %vm1422_vm13, %v1172_v24, %v1550_v34  ;;  %v1489_v40 = vmul.f32 0.2, %v929_v35  ;;  %3133 = vst [vmem:[%s3953_s8 + $0x58] sm:$0xff] %v2861_v36   ;;  %v921_v44 = vadd.f32 %v3937_v8, %v920_v18  ;;  %v3304_v45 = vpop.f32.mrb[28].mxu0  ;;  %v3368_v46 = vpop.f32.mrb[28].mxu1  ;;  %v1177_v50 = vadd.f32 %v3937_v8, %v1176_v19 }
 0x182   : > { %v3021_v41 = vpack.c.bf16 %v1678_v38, %v1677_v22  ;;  %v1612_v42 = vsel %vm1356_vm14, %v908_v29, %v1484_v37  ;;  %v1676_v48 = vsel %vm1420_vm15, %v1164_v30, %v1548_v39  ;;  %v936_v51 = vpop.f32.mrb[29].mxu0  ;;  %v1192_v52 = vpop.f32.mrb[29].mxu1  ;;  %vm1425_vm1 = vcmp.gt.f32.partialorder %v1185_v43, 0.0 }
 0x183   : > { %v2856_v47 = vpack.c.bf16 %v1612_v42, %v1611_v27  ;;  %v1617_v49 = vsel %vm1361_vm0, %v929_v35, %v1489_v40  ;;  %v3016_v53 = vpack.c.bf16 %v1676_v48, %v1675_v28  ;;  %v1553_v54 = vmul.f32 0.2, %v1185_v43  ;;  %v3305_v55 = vpop.f32.mrb[30].mxu0  ;;  %v3369_v56 = vpop.f32.mrb[30].mxu1 }
 0x184   : > { %3165 = vst [vmem:[%s3953_s8 + $0x158] sm:$0xff] %v3021_v41   ;;  %vm1359_vm2 = vcmp.gt.f32.partialorder %v921_v44, 0.0  ;;  %v1487_v57 = vmul.f32 0.2, %v921_v44  ;;  %vm1423_vm3 = vcmp.gt.f32.partialorder %v1177_v50, 0.0  ;;  %v932_v59 = vadd.f32 %v3301_v25, %v3937_v8  ;;  %v939_v60 = vpop.f32.mrb[31].mxu0 }
 0x185   : > { %3132 = vst [vmem:[%s3953_s8 + $0x50] sm:$0xff] %v2856_v47   ;;  %v1551_v58 = vmul.f32 0.2, %v1177_v50  ;;  %3164 = vst [vmem:[%s3953_s8 + $0x150] sm:$0xff] %v3016_v53   ;;  %v1681_v61 = vsel %vm1425_vm1, %v1185_v43, %v1553_v54  ;;  %v1188_v62 = vadd.f32 %v3365_v26, %v3937_v8  ;;  %v924_v63 = vadd.f32 %v3937_v8, %v923_v31  ;;  %v1195_v1 = vpop.f32.mrb[31].mxu1 }
 0x186   : > { %v1180_v0 = vadd.f32 %v3937_v8, %v1179_v32  ;;  %v1615_v2 = vsel %vm1359_vm2, %v921_v44, %v1487_v57  ;;  %vm1362_vm4 = vcmp.gt.f32.partialorder %v932_v59, 0.0  ;;  %v1490_v4 = vmul.f32 0.2, %v932_v59 }
 0x187   : > { %v1679_v3 = vsel %vm1423_vm3, %v1177_v50, %v1551_v58  ;;  %vm1426_vm5 = vcmp.gt.f32.partialorder %v1188_v62, 0.0  ;;  %v1554_v5 = vmul.f32 0.2, %v1188_v62  ;;  %vm1360_vm6 = vcmp.gt.f32.partialorder %v924_v63, 0.0 }
 0x188   : > { %v1488_v6 = vmul.f32 0.2, %v924_v63  ;;  %v1618_v7 = vsel %vm1362_vm4, %v932_v59, %v1490_v4  ;;  %vm1424_vm7 = vcmp.gt.f32.partialorder %v1180_v0, 0.0  ;;  %v1552_v9 = vmul.f32 0.2, %v1180_v0 }
 0x189   : > { %v945_v10 = vadd.f32 %v3304_v45, %v3937_v8  ;;  %v2871_v11 = vpack.c.bf16 %v1618_v7, %v1617_v49  ;;  %v1682_v12 = vsel %vm1426_vm5, %v1188_v62, %v1554_v5  ;;  %v1201_v14 = vadd.f32 %v3368_v46, %v3937_v8  ;;  %v3308_v15 = vpop.f32.mrb[32].mxu0  ;;  %v3372_v16 = vpop.f32.mrb[32].mxu1 }
 0x18a   : > { %v1616_v13 = vsel %vm1360_vm6, %v924_v63, %v1488_v6  ;;  %v3031_v17 = vpack.c.bf16 %v1682_v12, %v1681_v61  ;;  %v1680_v19 = vsel %vm1424_vm7, %v1180_v0, %v1552_v9  ;;  %v952_v20 = vpop.f32.mrb[33].mxu0  ;;  %v1208_v21 = vpop.f32.mrb[33].mxu1  ;;  %v937_v26 = vadd.f32 %v3937_v8, %v936_v51 }
 0x18b   : > { %v2866_v18 = vpack.c.bf16 %v1616_v13, %v1615_v2  ;;  %vm1365_vm8 = vcmp.gt.f32.partialorder %v945_v10, 0.0  ;;  %3135 = vst [vmem:[%s3953_s8 + $0x68] sm:$0xff] %v2871_v11   ;;  %v3026_v22 = vpack.c.bf16 %v1680_v19, %v1679_v3  ;;  %v1493_v23 = vmul.f32 0.2, %v945_v10  ;;  %v3309_v25 = vpop.f32.mrb[34].mxu0  ;;  %v3373_v30 = vpop.f32.mrb[34].mxu1 }
 0x18c   : > { %vm1429_vm9 = vcmp.gt.f32.partialorder %v1201_v14, 0.0  ;;  %v1557_v24 = vmul.f32 0.2, %v1201_v14  ;;  %3167 = vst [vmem:[%s3953_s8 + $0x168] sm:$0xff] %v3031_v17   ;;  %v1193_v27 = vadd.f32 %v3937_v8, %v1192_v52  ;;  %v948_v28 = vadd.f32 %v3305_v55, %v3937_v8  ;;  %v955_v31 = vpop.f32.mrb[35].mxu0  ;;  %v1211_v36 = vpop.f32.mrb[35].mxu1 }
 0x18d   : > { %3134 = vst [vmem:[%s3953_s8 + $0x60] sm:$0xff] %v2866_v18   ;;  %v1204_v29 = vadd.f32 %v3369_v56, %v3937_v8  ;;  %3166 = vst [vmem:[%s3953_s8 + $0x160] sm:$0xff] %v3026_v22   ;;  %v1621_v32 = vsel %vm1365_vm8, %v945_v10, %v1493_v23  ;;  %v940_v34 = vadd.f32 %v3937_v8, %v939_v60  ;;  %vm1363_vm10 = vcmp.gt.f32.partialorder %v937_v26, 0.0 }
 0x18e   : > { %v1685_v33 = vsel %vm1429_vm9, %v1201_v14, %v1557_v24  ;;  %v1196_v35 = vadd.f32 %v3937_v8, %v1195_v1  ;;  %v1491_v37 = vmul.f32 0.2, %v937_v26  ;;  %vm1427_vm11 = vcmp.gt.f32.partialorder %v1193_v27, 0.0 }
 0x18f   : > { %v1555_v38 = vmul.f32 0.2, %v1193_v27  ;;  %vm1366_vm12 = vcmp.gt.f32.partialorder %v948_v28, 0.0  ;;  %v1494_v39 = vmul.f32 0.2, %v948_v28  ;;  %vm1430_vm13 = vcmp.gt.f32.partialorder %v1204_v29, 0.0 }
 0x190   : > { %v1558_v40 = vmul.f32 0.2, %v1204_v29  ;;  %v1619_v41 = vsel %vm1363_vm10, %v937_v26, %v1491_v37  ;;  %vm1364_vm14 = vcmp.gt.f32.partialorder %v940_v34, 0.0  ;;  %v1492_v43 = vmul.f32 0.2, %v940_v34 }
 0x191   : > { %v1683_v42 = vsel %vm1427_vm11, %v1193_v27, %v1555_v38  ;;  %v1622_v44 = vsel %vm1366_vm12, %v948_v28, %v1494_v39  ;;  %vm1428_vm15 = vcmp.gt.f32.partialorder %v1196_v35, 0.0  ;;  %v1556_v46 = vmul.f32 0.2, %v1196_v35  ;;  %v3312_v47 = vpop.f32.mrb[36].mxu0  ;;  %v3376_v48 = vpop.f32.mrb[36].mxu1 }
 0x192   : > { %v1686_v45 = vsel %vm1430_vm13, %v1204_v29, %v1558_v40  ;;  %v2881_v49 = vpack.c.bf16 %v1622_v44, %v1621_v32  ;;  %v1620_v51 = vsel %vm1364_vm14, %v940_v34, %v1492_v43  ;;  %v961_v52 = vadd.f32 %v3308_v15, %v3937_v8  ;;  %v4039_v53 = vpop.f32.mrb[37].mxu0  ;;  %v4041_v54 = vpop.f32.mrb[37].mxu1 }
 0x193   : > { %v3041_v50 = vpack.c.bf16 %v1686_v45, %v1685_v33  ;;  %v2876_v55 = vpack.c.bf16 %v1620_v51, %v1619_v41  ;;  %v1684_v56 = vsel %vm1428_vm15, %v1196_v35, %v1556_v46  ;;  %v1217_v57 = vadd.f32 %v3372_v16, %v3937_v8  ;;  %v3313_v59 = vpop.f32.mrb[38].mxu0  ;;  %v3377_v60 = vpop.f32.mrb[38].mxu1 }
 0x194   : > { %v953_v58 = vadd.f32 %v3937_v8, %v952_v20  ;;  %3137 = vst [vmem:[%s3953_s8 + $0x78] sm:$0xff] %v2881_v49   ;;  %v3036_v61 = vpack.c.bf16 %v1684_v56, %v1683_v42  ;;  %vm1369_vm0 = vcmp.gt.f32.partialorder %v961_v52, 0.0  ;;  %v1497_v62 = vmul.f32 0.2, %v961_v52  ;;  %v971_v0 = vpop.f32.mrb[39].mxu0  ;;  %v1227_v1 = vpop.f32.mrb[39].mxu1 }
 0x195   : > { %3169 = vst [vmem:[%s3953_s8 + $0x178] sm:$0xff] %v3041_v50   ;;  %v1209_v63 = vadd.f32 %v3937_v8, %v1208_v21  ;;  %3136 = vst [vmem:[%s3953_s8 + $0x70] sm:$0xff] %v2876_v55   ;;  %vm1433_vm1 = vcmp.gt.f32.partialorder %v1217_v57, 0.0  ;;  %v1561_v2 = vmul.f32 0.2, %v1217_v57  ;;  %v964_v6 = vadd.f32 %v3309_v25, %v3937_v8 }
 0x196   : > { %vm1367_vm2 = vcmp.gt.f32.partialorder %v953_v58, 0.0  ;;  %v1495_v3 = vmul.f32 0.2, %v953_v58  ;;  %3168 = vst [vmem:[%s3953_s8 + $0x170] sm:$0xff] %v3036_v61   ;;  %v1625_v4 = vsel %vm1369_vm0, %v961_v52, %v1497_v62  ;;  %v1220_v10 = vadd.f32 %v3373_v30, %v3937_v8 }
 0x197   : > { %vm1431_vm3 = vcmp.gt.f32.partialorder %v1209_v63, 0.0  ;;  %v1559_v5 = vmul.f32 0.2, %v1209_v63  ;;  %v1689_v7 = vsel %vm1433_vm1, %v1217_v57, %v1561_v2  ;;  %v956_v11 = vadd.f32 %v3937_v8, %v955_v31 }
 0x198   : > { %v1623_v9 = vsel %vm1367_vm2, %v953_v58, %v1495_v3  ;;  %vm1370_vm4 = vcmp.gt.f32.partialorder %v964_v6, 0.0  ;;  %v1498_v13 = vmul.f32 0.2, %v964_v6  ;;  %v1212_v14 = vadd.f32 %v3937_v8, %v1211_v36 }
 0x199   : > { %v1687_v12 = vsel %vm1431_vm3, %v1209_v63, %v1559_v5  ;;  %vm1434_vm5 = vcmp.gt.f32.partialorder %v1220_v10, 0.0  ;;  %v1562_v15 = vmul.f32 0.2, %v1220_v10  ;;  %vm1368_vm6 = vcmp.gt.f32.partialorder %v956_v11, 0.0  ;;  %v3316_v20 = vpop.f32.mrb[40].mxu0  ;;  %v3380_v21 = vpop.f32.mrb[40].mxu1 }
 0x19a   : > { %v1496_v16 = vmul.f32 0.2, %v956_v11  ;;  %v1626_v17 = vsel %vm1370_vm4, %v964_v6, %v1498_v13  ;;  %vm1432_vm7 = vcmp.gt.f32.partialorder %v1212_v14, 0.0  ;;  %v1560_v18 = vmul.f32 0.2, %v1212_v14  ;;  %v984_v26 = vpop.f32.mrb[41].mxu0 }
 0x19b   : > { %v977_v19 = vadd.f32 %v3312_v47, %v3937_v8  ;;  %v2891_v22 = vpack.c.bf16 %v1626_v17, %v1625_v4  ;;  %v1690_v23 = vsel %vm1434_vm5, %v1220_v10, %v1562_v15  ;;  %v1233_v25 = vadd.f32 %v3376_v48, %v3937_v8  ;;  %v1240_v27 = vpop.f32.mrb[41].mxu1  ;;  %v4056_v31 = vpop.f32.mrb[42].mxu0 }
 0x19c   : > { %v1624_v24 = vsel %vm1368_vm6, %v956_v11, %v1496_v16  ;;  %v3051_v28 = vpack.c.bf16 %v1690_v23, %v1689_v7  ;;  %v1688_v30 = vsel %vm1432_vm7, %v1212_v14, %v1560_v18  ;;  %v4058_v32 = vpop.f32.mrb[42].mxu1  ;;  %v4061_v36 = vpop.f32.mrb[43].mxu0  ;;  %v969_v37 = vadd.f32 %v3937_v8, %v4039_v53 }
 0x19d   : > { %v2886_v29 = vpack.c.bf16 %v1624_v24, %v1623_v9  ;;  %vm1373_vm8 = vcmp.gt.f32.partialorder %v977_v19, 0.0  ;;  %3139 = vst [vmem:[%s3953_s8 + $0x88] sm:$0xff] %v2891_v22   ;;  %v3046_v33 = vpack.c.bf16 %v1688_v30, %v1687_v12  ;;  %v1501_v34 = vmul.f32 0.2, %v977_v19  ;;  %v4071_v41 = vpop.f32.mrb[43].mxu1 }
 0x19e   : > { %vm1437_vm9 = vcmp.gt.f32.partialorder %v1233_v25, 0.0  ;;  %v1565_v35 = vmul.f32 0.2, %v1233_v25  ;;  %3171 = vst [vmem:[%s3953_s8 + $0x188] sm:$0xff] %v3051_v28   ;;  %v1225_v38 = vadd.f32 %v3937_v8, %v4041_v54  ;;  %v980_v39 = vadd.f32 %v3313_v59, %v3937_v8 }
 0x19f   : > { %3138 = vst [vmem:[%s3953_s8 + $0x80] sm:$0xff] %v2886_v29   ;;  %v1236_v40 = vadd.f32 %v3377_v60, %v3937_v8  ;;  %3170 = vst [vmem:[%s3953_s8 + $0x180] sm:$0xff] %v3046_v33   ;;  %v1629_v42 = vsel %vm1373_vm8, %v977_v19, %v1501_v34  ;;  %v972_v44 = vadd.f32 %v3937_v8, %v971_v0  ;;  %vm1371_vm10 = vcmp.gt.f32.partialorder %v969_v37, 0.0  ;;  %v4102_v19 = vld [vmem:[%s4329_s2] ss:$0 sm:$0xff] }
 0x1a0   : > { %v1693_v43 = vsel %vm1437_vm9, %v1233_v25, %v1565_v35  ;;  %v1228_v45 = vadd.f32 %v3937_v8, %v1227_v1  ;;  %v1499_v46 = vmul.f32 0.2, %v969_v37  ;;  %vm1435_vm11 = vcmp.gt.f32.partialorder %v1225_v38, 0.0 }
 0x1a1   : > { %v1563_v47 = vmul.f32 0.2, %v1225_v38  ;;  %vm1374_vm12 = vcmp.gt.f32.partialorder %v980_v39, 0.0  ;;  %v1502_v48 = vmul.f32 0.2, %v980_v39  ;;  %vm1438_vm13 = vcmp.gt.f32.partialorder %v1236_v40, 0.0 }
 0x1a2   : > { %v1566_v49 = vmul.f32 0.2, %v1236_v40  ;;  %v1627_v50 = vsel %vm1371_vm10, %v969_v37, %v1499_v46  ;;  %vm1372_vm14 = vcmp.gt.f32.partialorder %v972_v44, 0.0  ;;  %v1500_v52 = vmul.f32 0.2, %v972_v44  ;;  %v3320_v53 = vpop.f32.mrb[44].mxu0 }
 0x1a3   : > { %v1691_v51 = vsel %vm1435_vm11, %v1225_v38, %v1563_v47  ;;  %v3384_v54 = vpop.f32.mrb[44].mxu1  ;;  %v1630_v55 = vsel %vm1374_vm12, %v980_v39, %v1502_v48  ;;  %vm1436_vm15 = vcmp.gt.f32.partialorder %v1228_v45, 0.0  ;;  %v1564_v57 = vmul.f32 0.2, %v1228_v45  ;;  %v4077_v58 = vpop.f32.mrb[45].mxu0 }
 0x1a4   : > { %v1694_v56 = vsel %vm1438_vm13, %v1236_v40, %v1566_v49  ;;  %v4079_v59 = vpop.f32.mrb[45].mxu1  ;;  %v2901_v60 = vpack.c.bf16 %v1630_v55, %v1629_v42  ;;  %v1628_v62 = vsel %vm1372_vm14, %v972_v44, %v1500_v52  ;;  %v993_v63 = vadd.f32 %v3316_v20, %v3937_v8  ;;  %v4082_v0 = vpop.f32.mrb[46].mxu0 }
 0x1a5   : > { %v3061_v61 = vpack.c.bf16 %v1694_v56, %v1693_v43  ;;  %v4084_v1 = vpop.f32.mrb[46].mxu1  ;;  %v2896_v2 = vpack.c.bf16 %v1628_v62, %v1627_v50  ;;  %v1692_v3 = vsel %vm1436_vm15, %v1228_v45, %v1564_v57  ;;  %v1249_v4 = vadd.f32 %v3380_v21, %v3937_v8  ;;  %v4088_v6 = vpop.f32.mrb[47].mxu0 }
 0x1a6   : > { %v985_v5 = vadd.f32 %v3937_v8, %v984_v26  ;;  %v4090_v7 = vpop.f32.mrb[47].mxu1  ;;  %3141 = vst [vmem:[%s3953_s8 + $0x98] sm:$0xff] %v2901_v60   ;;  %v3056_v9 = vpack.c.bf16 %v1692_v3, %v1691_v51  ;;  %vm1377_vm0 = vcmp.gt.f32.partialorder %v993_v63, 0.0  ;;  %v1505_v10 = vmul.f32 0.2, %v993_v63 }
 0x1a7   : > { %3173 = vst [vmem:[%s3953_s8 + $0x198] sm:$0xff] %v3061_v61   ;;  %v1241_v11 = vadd.f32 %v3937_v8, %v1240_v27  ;;  %3140 = vst [vmem:[%s3953_s8 + $0x90] sm:$0xff] %v2896_v2   ;;  %vm1441_vm1 = vcmp.gt.f32.partialorder %v1249_v4, 0.0  ;;  %v1569_v12 = vmul.f32 0.2, %v1249_v4  ;;  %v996_v16 = vadd.f32 %v4056_v31, %v3937_v8 }
 0x1a8   : > { %vm1375_vm2 = vcmp.gt.f32.partialorder %v985_v5, 0.0  ;;  %v1503_v13 = vmul.f32 0.2, %v985_v5  ;;  %3172 = vst [vmem:[%s3953_s8 + $0x190] sm:$0xff] %v3056_v9   ;;  %v1633_v14 = vsel %vm1377_vm0, %v993_v63, %v1505_v10  ;;  %v1252_v20 = vadd.f32 %v4102_v19, %v4058_v32 }
 0x1a9   : > { %vm1439_vm3 = vcmp.gt.f32.partialorder %v1241_v11, 0.0  ;;  %v1567_v15 = vmul.f32 0.2, %v1241_v11  ;;  %v1697_v17 = vsel %vm1441_vm1, %v1249_v4, %v1569_v12  ;;  %v988_v21 = vadd.f32 %v4102_v19, %v4061_v36  ;;  %v4108_v22 = vpop.f32.mrb[48].mxu0  ;;  %v4110_v23 = vpop.f32.mrb[48].mxu1 }
 0x1aa   : > { %v1631_v18 = vsel %vm1375_vm2, %v985_v5, %v1503_v13  ;;  %vm1378_vm4 = vcmp.gt.f32.partialorder %v996_v16, 0.0  ;;  %v1506_v8 = vmul.f32 0.2, %v996_v16  ;;  %v1244_v25 = vadd.f32 %v4102_v19, %v4071_v41  ;;  %v4114_v26 = vpop.f32.mrb[49].mxu0  ;;  %v4116_v27 = vpop.f32.mrb[49].mxu1 }
 0x1ab   : > { %v1695_v24 = vsel %vm1439_vm3, %v1241_v11, %v1567_v15  ;;  %vm1442_vm5 = vcmp.gt.f32.partialorder %v1252_v20, 0.0  ;;  %v1570_v28 = vmul.f32 0.2, %v1252_v20  ;;  %vm1376_vm6 = vcmp.gt.f32.partialorder %v988_v21, 0.0  ;;  %v4119_v33 = vpop.f32.mrb[50].mxu0  ;;  %v4121_v34 = vpop.f32.mrb[50].mxu1 }
 0x1ac   : > { %v1504_v29 = vmul.f32 0.2, %v988_v21  ;;  %v1634_v30 = vsel %vm1378_vm4, %v996_v16, %v1506_v8  ;;  %vm1440_vm7 = vcmp.gt.f32.partialorder %v1244_v25, 0.0  ;;  %v1568_v31 = vmul.f32 0.2, %v1244_v25  ;;  %v4124_v39 = vpop.f32.mrb[51].mxu0 }
 0x1ad   : > { %v1009_v32 = vadd.f32 %v4102_v19, %v3320_v53  ;;  %v2911_v35 = vpack.c.bf16 %v1634_v30, %v1633_v14  ;;  %v1698_v36 = vsel %vm1442_vm5, %v1252_v20, %v1570_v28  ;;  %v1265_v38 = vadd.f32 %v4102_v19, %v3384_v54  ;;  %v4126_v40 = vpop.f32.mrb[51].mxu1 }
 0x1ae   : > { %v1632_v37 = vsel %vm1376_vm6, %v988_v21, %v1504_v29  ;;  %v3071_v41 = vpack.c.bf16 %v1698_v36, %v1697_v17  ;;  %v1696_v43 = vsel %vm1440_vm7, %v1244_v25, %v1568_v31  ;;  %v1001_v47 = vadd.f32 %v4102_v19, %v4077_v58 }
 0x1af   : > { %v2906_v42 = vpack.c.bf16 %v1632_v37, %v1631_v18  ;;  %vm1381_vm8 = vcmp.gt.f32.partialorder %v1009_v32, 0.0  ;;  %3143 = vst [vmem:[%s3953_s8 + $0xa8] sm:$0xff] %v2911_v35   ;;  %v3066_v44 = vpack.c.bf16 %v1696_v43, %v1695_v24  ;;  %v1509_v45 = vmul.f32 0.2, %v1009_v32 }
 0x1b0   : > { %vm1445_vm9 = vcmp.gt.f32.partialorder %v1265_v38, 0.0  ;;  %v1573_v46 = vmul.f32 0.2, %v1265_v38  ;;  %3175 = vst [vmem:[%s3953_s8 + $0x1a8] sm:$0xff] %v3071_v41   ;;  %v1257_v48 = vadd.f32 %v4102_v19, %v4079_v59  ;;  %v1012_v49 = vadd.f32 %v4102_v19, %v4082_v0 }
 0x1b1   : > { %3142 = vst [vmem:[%s3953_s8 + $0xa0] sm:$0xff] %v2906_v42   ;;  %v1268_v50 = vadd.f32 %v4102_v19, %v4084_v1  ;;  %3174 = vst [vmem:[%s3953_s8 + $0x1a0] sm:$0xff] %v3066_v44   ;;  %v1637_v51 = vsel %vm1381_vm8, %v1009_v32, %v1509_v45  ;;  %v1004_v53 = vadd.f32 %v4102_v19, %v4088_v6  ;;  %v4144_v55 = vpop.f32.mrb[52].mxu0  ;;  %v4146_v56 = vpop.f32.mrb[52].mxu1  ;;  %vm1379_vm10 = vcmp.gt.f32.partialorder %v1001_v47, 0.0 }
 0x1b2   : > { %v1701_v52 = vsel %vm1445_vm9, %v1265_v38, %v1573_v46  ;;  %v1260_v54 = vadd.f32 %v4102_v19, %v4090_v7  ;;  %v1507_v57 = vmul.f32 0.2, %v1001_v47  ;;  %vm1443_vm11 = vcmp.gt.f32.partialorder %v1257_v48, 0.0  ;;  %v4148_v0 = vpop.f32.mrb[53].mxu0  ;;  %v4150_v1 = vpop.f32.mrb[53].mxu1 }
 0x1b3   : > { %v1571_v58 = vmul.f32 0.2, %v1257_v48  ;;  %vm1382_vm12 = vcmp.gt.f32.partialorder %v1012_v49, 0.0  ;;  %v1510_v59 = vmul.f32 0.2, %v1012_v49  ;;  %vm1446_vm13 = vcmp.gt.f32.partialorder %v1268_v50, 0.0 }
 0x1b4   : > { %v1574_v60 = vmul.f32 0.2, %v1268_v50  ;;  %v1635_v61 = vsel %vm1379_vm10, %v1001_v47, %v1507_v57  ;;  %vm1380_vm14 = vcmp.gt.f32.partialorder %v1004_v53, 0.0  ;;  %v1508_v63 = vmul.f32 0.2, %v1004_v53  ;;  %v4152_v5 = vpop.f32.mrb[54].mxu0 }
 0x1b5   : > { %v1699_v62 = vsel %vm1443_vm11, %v1257_v48, %v1571_v58  ;;  %v1638_v2 = vsel %vm1382_vm12, %v1012_v49, %v1510_v59  ;;  %vm1444_vm15 = vcmp.gt.f32.partialorder %v1260_v54, 0.0  ;;  %v1572_v4 = vmul.f32 0.2, %v1260_v54  ;;  %v4154_v6 = vpop.f32.mrb[54].mxu1  ;;  %v4158_v12 = vpop.f32.mrb[55].mxu0 }
 0x1b6   : > { %v1702_v3 = vsel %vm1446_vm13, %v1268_v50, %v1574_v60  ;;  %v2921_v7 = vpack.c.bf16 %v1638_v2, %v1637_v51  ;;  %v1636_v10 = vsel %vm1380_vm14, %v1004_v53, %v1508_v63  ;;  %v1025_v11 = vadd.f32 %v4102_v19, %v4108_v22  ;;  %v4160_v13 = vpop.f32.mrb[55].mxu1 }
 0x1b7   : > { %v3081_v9 = vpack.c.bf16 %v1702_v3, %v1701_v52  ;;  %v2916_v14 = vpack.c.bf16 %v1636_v10, %v1635_v61  ;;  %v1700_v15 = vsel %vm1444_vm15, %v1260_v54, %v1572_v4  ;;  %v1281_v16 = vadd.f32 %v4102_v19, %v4110_v23 }
 0x1b8   : > { %v1017_v17 = vadd.f32 %v4102_v19, %v4114_v26  ;;  %3145 = vst [vmem:[%s3953_s8 + $0xb8] sm:$0xff] %v2921_v7   ;;  %v3076_v18 = vpack.c.bf16 %v1700_v15, %v1699_v62  ;;  %vm1385_vm0 = vcmp.gt.f32.partialorder %v1025_v11, 0.0  ;;  %v1513_v20 = vmul.f32 0.2, %v1025_v11 }
 0x1b9   : > { %3177 = vst [vmem:[%s3953_s8 + $0x1b8] sm:$0xff] %v3081_v9   ;;  %v1273_v21 = vadd.f32 %v4102_v19, %v4116_v27  ;;  %3144 = vst [vmem:[%s3953_s8 + $0xb0] sm:$0xff] %v2916_v14   ;;  %vm1449_vm1 = vcmp.gt.f32.partialorder %v1281_v16, 0.0  ;;  %v1577_v22 = vmul.f32 0.2, %v1281_v16  ;;  %v1028_v25 = vadd.f32 %v4102_v19, %v4119_v33  ;;  %v4174_v26 = vpop.f32.mrb[56].mxu0 }
 0x1ba   : > { %vm1383_vm2 = vcmp.gt.f32.partialorder %v1017_v17, 0.0  ;;  %v1511_v24 = vmul.f32 0.2, %v1017_v17  ;;  %3176 = vst [vmem:[%s3953_s8 + $0x1b0] sm:$0xff] %v3076_v18   ;;  %v1641_v8 = vsel %vm1385_vm0, %v1025_v11, %v1513_v20  ;;  %v4176_v28 = vpop.f32.mrb[56].mxu1  ;;  %v1284_v27 = vadd.f32 %v4102_v19, %v4121_v34  ;;  %v4182_v32 = vpop.f32.mrb[57].mxu0 }
 0x1bb   : > { %vm1447_vm3 = vcmp.gt.f32.partialorder %v1273_v21, 0.0  ;;  %v1575_v23 = vmul.f32 0.2, %v1273_v21  ;;  %v1705_v29 = vsel %vm1449_vm1, %v1281_v16, %v1577_v22  ;;  %v1020_v31 = vadd.f32 %v4102_v19, %v4124_v39  ;;  %v4184_v35 = vpop.f32.mrb[57].mxu1  ;;  %v4188_v38 = vpop.f32.mrb[58].mxu0 }
 0x1bc   : > { %v1639_v30 = vsel %vm1383_vm2, %v1017_v17, %v1511_v24  ;;  %vm1386_vm4 = vcmp.gt.f32.partialorder %v1028_v25, 0.0  ;;  %v1514_v37 = vmul.f32 0.2, %v1028_v25  ;;  %v1276_v33 = vadd.f32 %v4102_v19, %v4126_v40  ;;  %v4190_v41 = vpop.f32.mrb[58].mxu1  ;;  %v4194_v45 = vpop.f32.mrb[59].mxu0 }
 0x1bd   : > { %v1703_v36 = vsel %vm1447_vm3, %v1273_v21, %v1575_v23  ;;  %vm1450_vm5 = vcmp.gt.f32.partialorder %v1284_v27, 0.0  ;;  %v1578_v42 = vmul.f32 0.2, %v1284_v27  ;;  %vm1384_vm6 = vcmp.gt.f32.partialorder %v1020_v31, 0.0  ;;  %v4196_v46 = vpop.f32.mrb[59].mxu1 }
 0x1be   : > { %v1512_v34 = vmul.f32 0.2, %v1020_v31  ;;  %v1642_v39 = vsel %vm1386_vm4, %v1028_v25, %v1514_v37  ;;  %vm1448_vm7 = vcmp.gt.f32.partialorder %v1276_v33, 0.0  ;;  %v1576_v43 = vmul.f32 0.2, %v1276_v33 }
 0x1bf   : > { %v1041_v44 = vadd.f32 %v4102_v19, %v4144_v55  ;;  %v2931_v40 = vpack.c.bf16 %v1642_v39, %v1641_v8  ;;  %v1706_v47 = vsel %vm1450_vm5, %v1284_v27, %v1578_v42  ;;  %v1297_v49 = vadd.f32 %v4102_v19, %v4146_v56 }
 0x1c0   : > { %v1640_v48 = vsel %vm1384_vm6, %v1020_v31, %v1512_v34  ;;  %v3091_v50 = vpack.c.bf16 %v1706_v47, %v1705_v29  ;;  %v1704_v52 = vsel %vm1448_vm7, %v1276_v33, %v1576_v43  ;;  %v1033_v58 = vadd.f32 %v4102_v19, %v4148_v0 }
 0x1c1   : > { %v2926_v51 = vpack.c.bf16 %v1640_v48, %v1639_v30  ;;  %vm1389_vm8 = vcmp.gt.f32.partialorder %v1041_v44, 0.0  ;;  %3147 = vst [vmem:[%s3953_s8 + $0xc8] sm:$0xff] %v2931_v40   ;;  %v3086_v53 = vpack.c.bf16 %v1704_v52, %v1703_v36  ;;  %v1517_v54 = vmul.f32 0.2, %v1041_v44  ;;  %v4201_v57 = vpop.f32.mrb[60].mxu0  ;;  %v4213_v61 = vpop.f32.mrb[60].mxu1 }
 0x1c2   : > { %vm1453_vm9 = vcmp.gt.f32.partialorder %v1297_v49, 0.0  ;;  %v1581_v55 = vmul.f32 0.2, %v1297_v49  ;;  %3179 = vst [vmem:[%s3953_s8 + $0x1c8] sm:$0xff] %v3091_v50   ;;  %v1289_v56 = vadd.f32 %v4102_v19, %v4150_v1  ;;  %v1044_v59 = vadd.f32 %v4102_v19, %v4152_v5  ;;  %v4215_v62 = vpop.f32.mrb[61].mxu0  ;;  %v4223_v3 = vpop.f32.mrb[61].mxu1 }
 0x1c3   : > { %3146 = vst [vmem:[%s3953_s8 + $0xc0] sm:$0xff] %v2926_v51   ;;  %v1300_v60 = vadd.f32 %v4102_v19, %v4154_v6  ;;  %3178 = vst [vmem:[%s3953_s8 + $0x1c0] sm:$0xff] %v3086_v53   ;;  %v1645_v63 = vsel %vm1389_vm8, %v1041_v44, %v1517_v54  ;;  %v1036_v0 = vadd.f32 %v4102_v19, %v4158_v12  ;;  %v4225_v4 = vpop.f32.mrb[62].mxu0  ;;  %vm1387_vm10 = vcmp.gt.f32.partialorder %v1033_v58, 0.0  ;;  %v4227_v12 = vpop.f32.mrb[62].mxu1 }
 0x1c4   : > { %v1709_v2 = vsel %vm1453_vm9, %v1297_v49, %v1581_v55  ;;  %v1292_v1 = vadd.f32 %v4102_v19, %v4160_v13  ;;  %v1515_v5 = vmul.f32 0.2, %v1033_v58  ;;  %vm1451_vm11 = vcmp.gt.f32.partialorder %v1289_v56, 0.0  ;;  %v4229_v13 = vpop.f32.mrb[63].mxu0  ;;  %v1323_v18 = vpop.f32.mrb[63].mxu1 }
 0x1c5   : > { %v1579_v6 = vmul.f32 0.2, %v1289_v56  ;;  %vm1390_vm12 = vcmp.gt.f32.partialorder %v1044_v59, 0.0  ;;  %v1518_v7 = vmul.f32 0.2, %v1044_v59  ;;  %vm1454_vm13 = vcmp.gt.f32.partialorder %v1300_v60, 0.0 }
 0x1c6   : > { %v1582_v9 = vmul.f32 0.2, %v1300_v60  ;;  %v1643_v10 = vsel %vm1387_vm10, %v1033_v58, %v1515_v5  ;;  %vm1388_vm14 = vcmp.gt.f32.partialorder %v1036_v0, 0.0  ;;  %v1516_v14 = vmul.f32 0.2, %v1036_v0 }
 0x1c7   : > { %v1707_v11 = vsel %vm1451_vm11, %v1289_v56, %v1579_v6  ;;  %v1646_v15 = vsel %vm1390_vm12, %v1044_v59, %v1518_v7  ;;  %vm1452_vm15 = vcmp.gt.f32.partialorder %v1292_v1, 0.0  ;;  %v1580_v17 = vmul.f32 0.2, %v1292_v1 }
 0x1c8   : > { %v1710_v16 = vsel %vm1454_vm13, %v1300_v60, %v1582_v9  ;;  %v2941_v20 = vpack.c.bf16 %v1646_v15, %v1645_v63  ;;  %v1644_v22 = vsel %vm1388_vm14, %v1036_v0, %v1516_v14  ;;  %v1057_v24 = vadd.f32 %v4102_v19, %v4174_v26 }
 0x1c9   : > { %v3101_v21 = vpack.c.bf16 %v1710_v16, %v1709_v2  ;;  %v2936_v8 = vpack.c.bf16 %v1644_v22, %v1643_v10  ;;  %v1708_v23 = vsel %vm1452_vm15, %v1292_v1, %v1580_v17  ;;  %v1313_v25 = vadd.f32 %v4102_v19, %v4176_v28 }
 0x1ca   : > { %v1049_v29 = vadd.f32 %v4102_v19, %v4182_v32  ;;  %3149 = vst [vmem:[%s3953_s8 + $0xd8] sm:$0xff] %v2941_v20   ;;  %v3096_v30 = vpack.c.bf16 %v1708_v23, %v1707_v11  ;;  %vm1393_vm0 = vcmp.gt.f32.partialorder %v1057_v24, 0.0  ;;  %v1521_v27 = vmul.f32 0.2, %v1057_v24 }
 0x1cb   : > { %3181 = vst [vmem:[%s3953_s8 + $0x1d8] sm:$0xff] %v3101_v21   ;;  %v1305_v31 = vadd.f32 %v4102_v19, %v4184_v35  ;;  %3148 = vst [vmem:[%s3953_s8 + $0xd0] sm:$0xff] %v2936_v8   ;;  %vm1457_vm1 = vcmp.gt.f32.partialorder %v1313_v25, 0.0  ;;  %v1585_v26 = vmul.f32 0.2, %v1313_v25  ;;  %v1060_v28 = vadd.f32 %v4102_v19, %v4188_v38 }
 0x1cc   : > { %vm1391_vm2 = vcmp.gt.f32.partialorder %v1049_v29, 0.0  ;;  %v1519_v36 = vmul.f32 0.2, %v1049_v29  ;;  %3180 = vst [vmem:[%s3953_s8 + $0x1d0] sm:$0xff] %v3096_v30   ;;  %v1649_v37 = vsel %vm1393_vm0, %v1057_v24, %v1521_v27  ;;  %v1316_v42 = vadd.f32 %v4102_v19, %v4190_v41 }
 0x1cd   : > { %vm1455_vm3 = vcmp.gt.f32.partialorder %v1305_v31, 0.0  ;;  %v1713_v32 = vsel %vm1457_vm1, %v1313_v25, %v1585_v26  ;;  %v1583_v33 = vmul.f32 0.2, %v1305_v31  ;;  %v1052_v34 = vadd.f32 %v4102_v19, %v4194_v45 }
 0x1ce   : > { %v1647_v35 = vsel %vm1391_vm2, %v1049_v29, %v1519_v36  ;;  %vm1394_vm4 = vcmp.gt.f32.partialorder %v1060_v28, 0.0  ;;  %v1522_v39 = vmul.f32 0.2, %v1060_v28  ;;  %v1308_v43 = vadd.f32 %v4102_v19, %v4196_v46 }
 0x1cf   : > { %vm1458_vm5 = vcmp.gt.f32.partialorder %v1316_v42, 0.0  ;;  %v1586_v44 = vmul.f32 0.2, %v1316_v42  ;;  %vm1392_vm6 = vcmp.gt.f32.partialorder %v1052_v34, 0.0  ;;  %v1520_v40 = vmul.f32 0.2, %v1052_v34 }
 0x1d0   : > { %v1650_v38 = vsel %vm1394_vm4, %v1060_v28, %v1522_v39  ;;  %vm1456_vm7 = vcmp.gt.f32.partialorder %v1308_v43, 0.0  ;;  %v1584_v47 = vmul.f32 0.2, %v1308_v43  ;;  %v1073_v41 = vadd.f32 %v4102_v19, %v4201_v57 }
 0x1d1   : > { %v2951_v45 = vpack.c.bf16 %v1650_v38, %v1649_v37  ;;  %v1714_v48 = vsel %vm1458_vm5, %v1316_v42, %v1586_v44  ;;  %v1648_v49 = vsel %vm1392_vm6, %v1052_v34, %v1520_v40  ;;  %v1329_v50 = vadd.f32 %v4102_v19, %v4213_v61 }
 0x1d2   : > { %v1711_v46 = vsel %vm1455_vm3, %v1305_v31, %v1583_v33  ;;  %v3111_v51 = vpack.c.bf16 %v1714_v48, %v1713_v32  ;;  %v2946_v52 = vpack.c.bf16 %v1648_v49, %v1647_v35  ;;  %v1712_v53 = vsel %vm1456_vm7, %v1308_v43, %v1584_v47 }
 0x1d3   : > { %3151 = vst [vmem:[%s3953_s8 + $0xe8] sm:$0xff] %v2951_v45   ;;  %v3106_v54 = vpack.c.bf16 %v1712_v53, %v1711_v46  ;;  %vm1397_vm8 = vcmp.gt.f32.partialorder %v1073_v41, 0.0  ;;  %v1525_v55 = vmul.f32 0.2, %v1073_v41  ;;  %v1589_v58 = vmul.f32 0.2, %v1329_v50 }
 0x1d4   : > { %3183 = vst [vmem:[%s3953_s8 + $0x1e8] sm:$0xff] %v3111_v51   ;;  %3150 = vst [vmem:[%s3953_s8 + $0xe0] sm:$0xff] %v2946_v52   ;;  %v1065_v57 = vadd.f32 %v4102_v19, %v4215_v62  ;;  %v1321_v56 = vadd.f32 %v4102_v19, %v4223_v3  ;;  %v1076_v59 = vadd.f32 %v4102_v19, %v4225_v4  ;;  %vm1461_vm9 = vcmp.gt.f32.partialorder %v1329_v50, 0.0 }
 0x1d5   : > { %v1332_v60 = vadd.f32 %v4102_v19, %v4227_v12  ;;  %3182 = vst [vmem:[%s3953_s8 + $0x1e0] sm:$0xff] %v3106_v54   ;;  %v1068_v61 = vadd.f32 %v4102_v19, %v4229_v13  ;;  %v1324_v63 = vadd.f32 %v4102_v19, %v1323_v18  ;;  %v1653_v2 = vsel %vm1397_vm8, %v1073_v41, %v1525_v55 }
 0x1d6   : > { %vm1395_vm10 = vcmp.gt.f32.partialorder %v1065_v57, 0.0  ;;  %v1523_v62 = vmul.f32 0.2, %v1065_v57  ;;  %v1587_v0 = vmul.f32 0.2, %v1321_v56  ;;  %vm1398_vm11 = vcmp.gt.f32.partialorder %v1076_v59, 0.0 }
 0x1d7   : > { %v1526_v1 = vmul.f32 0.2, %v1076_v59  ;;  %vm1462_vm12 = vcmp.gt.f32.partialorder %v1332_v60, 0.0  ;;  %v1590_v3 = vmul.f32 0.2, %v1332_v60  ;;  %v1717_v4 = vsel %vm1461_vm9, %v1329_v50, %v1589_v58 }
 0x1d8   : > { %vm1459_vm13 = vcmp.gt.f32.partialorder %v1321_v56, 0.0  ;;  %vm1396_vm14 = vcmp.gt.f32.partialorder %v1068_v61, 0.0  ;;  %v1524_v5 = vmul.f32 0.2, %v1068_v61  ;;  %vm1460_vm15 = vcmp.gt.f32.partialorder %v1324_v63, 0.0 }
 0x1d9   : > { %v1654_v6 = vsel %vm1398_vm11, %v1076_v59, %v1526_v1  ;;  %v1718_v7 = vsel %vm1462_vm12, %v1332_v60, %v1590_v3  ;;  %v1588_v19 = vmul.f32 0.2, %v1324_v63  ;;  %v1651_v9 = vsel %vm1395_vm10, %v1065_v57, %v1523_v62 }
 0x1da   : > { %v2961_v10 = vpack.c.bf16 %v1654_v6, %v1653_v2  ;;  %v3121_v11 = vpack.c.bf16 %v1718_v7, %v1717_v4  ;;  %v1652_v14 = vsel %vm1396_vm14, %v1068_v61, %v1524_v5  ;;  %v1715_v12 = vsel %vm1459_vm13, %v1321_v56, %v1587_v0 }
 0x1db   : > { %v2956_v13 = vpack.c.bf16 %v1652_v14, %v1651_v9  ;;  %v1716_v15 = vsel %vm1460_vm15, %v1324_v63, %v1588_v19 }
 0x1dc   : > { %3153 = vst [vmem:[%s3953_s8 + $0xf8] sm:$0xff] %v2961_v10   ;;  %3185 = vst [vmem:[%s3953_s8 + $0x1f8] sm:$0xff] %v3121_v11   ;;  %v3116_v16 = vpack.c.bf16 %v1716_v15, %v1715_v12 }
 0x1dd   : > { %3152 = vst [vmem:[%s3953_s8 + $0xf0] sm:$0xff] %v2956_v13  }
 0x1de   : > { %3184 = vst [vmem:[%s3953_s8 + $0x1f0] sm:$0xff] %v3116_v16  }
 0x1df   : > { %3623 = shalt.err (!%p3620_p7)
}
 0x1e0   : > { %s3624_s7 = scalar_lea.hbm %s4277_s27, 8192  ;;  %s3628_s18 = scalar_lea.hbm %s4330_s3, 16384 }
 0x1e1   : > { %p3625_p9 = scmp.ne.s32.totalorder %s4277_s27, %s3624_s7  ;;  %p3629_p5 = scmp.lt.u32.totalorder %s4277_s27, %s4330_s3 }
 0x1e2   : > { %p3630_p11 = scmp.lt.u32.totalorder %s3628_s18, %s3624_s7  ;;  %p3632_p4 = scmp.lt.u32.totalorder %s3624_s7, %s4277_s27 }
 0x1e3   : > { %p3626_p1 = pnand %p3625_p9, %p3803_p12 }
 0x1e4   : > { %p3631_p2 = por %p3630_p11, %p3629_p5 }
 0x1e5   : > { %p3627_p0 = pneg %p3626_p1 }
 0x1e6   : > { %p3633_p6 = por %p3632_p4, %p3631_p2 }
 0x1e8   : > { %p3634_p8 = pnand %p3633_p6, %p3627_p0 }
 0x1ea   : > { %3637 = shalt.err (!%p3634_p8)
}
 0x1eb   : > { %s3687_s9 = smov 64   ;;  %s3688_s4 = smov 4  }
 0x1ec   : > { %3424 = dma.vmem_to_hbm [thread:$0]  (%p3803_p12), %s4279_s5, 8192, %s4277_s27, %s2360_s28, %s3687_s9, %s3687_s9, %s3688_s4  }
 0x1ed PF: > { %s2388_s25 = sand.u32 1, %s3668_s12   ;;  %p4345_p10 = scmp.ne.s32.totalorder %s4335_s19, 0 }
 0x1ee   : > { %p4346_p13 = scmp.ge.s32.totalorder %s3680_s15, 2  ;;  %s2389_s11 = scalar_lea.sflag [#allocation4], %s2388_s25 }
 0x1f0   : > { %p3435_p3 = pnand %p4346_p13, %p4345_p10 }
 0x1f2   : > { %3663 = dma.done.wait (!%p3435_p3), %s2389_s11, 8192  }
 0x1f3   : > { %3665 = vsyncadd (!%p3435_p3), %s2389_s11, 4294959104  ;;  %p17_p7 = scmp.ge.s32.totalorder %s3765_s24, 4   ;;  %s4347_s12 = smov %s3672_s13 }
 0x1f4   : > { %s4348_s13 = smov %s3676_s14  ;;  %s4349_s14 = smov %s3799_s17 }
 0x1f5   : > { %s4350_s15 = smov %s3765_s24  ;;  %19 = sbr.rel (!%p17_p7) target bundleno = 6 (0x6), region = 81 }
 0x1fc   :  { %2394 = vsyncpa [#allocation3], 1 }
 0x1fd   :  { %2396 = vsyncpa [#allocation3 + $0x1], 1 }
 0x1fe   :  { %2397 = vsyncpa [#allocation6], 1 }
 0x1ff   :  { %2398 = vsyncpa [#allocation4], 1 }
 0x200   :  { %2400 = vsyncpa [#allocation4 + $0x1], 1 }

</bundles_post_ra>
